<compile_context>
chip_gen: v6e
topology: v6e:2x2x1
jax: 0.10.0
libtpu: 0.0.40
codegen_flags: <defaults>
</compile_context>

<pallas_src>
import functools

import jax
import jax.numpy as jnp
from jax.experimental import pallas as pl
from jax.experimental.pallas import tpu as pltpu  # noqa: F401

# ----------------------------- model config (small, synthetic) --------------
MEL_CHANNEL = 32        # input_size
MODEL_HIDDEN_SIZE = 32  # hidden_size
MODEL_LAYERS = 2        # num_layers
NUM_CLASSES = 8
BATCH = 2
SEQ = 8
METHOD = "mean"         # matches forward(); "last" also supported


# ----------------------------- fused Pallas kernel ---------------------------
def fused_lstm_head_kernel(*refs, num_layers, method):
    """Entire forward pass in one kernel.

    refs layout (inputs, then output):
      refs[0]                       : x       [B, T, D]   batch_first input
      refs[1 + 3*l + 0]             : w_ih_t  [D_l, 4H]   layer l (pre-transposed)
      refs[1 + 3*l + 1]             : w_hh_t  [H, 4H]
      refs[1 + 3*l + 2]             : bias    [1, 4H]     (b_ih + b_hh)
      refs[1+3*L : 5+3*L]           : fc1_w [H,H], fc1_b [1,H], fc2_w [H,C], fc2_b [1,C]
      refs[-1]                      : out     [B, C]      log-probabilities
    Gate order follows PyTorch: i, f, g, o.
    """
    x_ref = refs[0]
    lstm_refs = refs[1:1 + 3 * num_layers]
    fc1w_ref, fc1b_ref, fc2w_ref, fc2b_ref = refs[1 + 3 * num_layers:5 + 3 * num_layers]
    out_ref = refs[-1]

    x = x_ref[...]                               # [B, T, D]
    B, T, _ = x.shape
    H = lstm_refs[1].shape[0]

    feat = None
    prev_h_steps = None                          # per-step hiddens of previous layer

    for layer in range(num_layers):
        wih = lstm_refs[3 * layer][...]          # [D_in, 4H]
        whh = lstm_refs[3 * layer + 1][...]      # [H, 4H]
        bias = lstm_refs[3 * layer + 2][...]     # [1, 4H]
        is_last = layer == num_layers - 1

        # ---- hoisted input projection (kept OFF the serial recurrence path) ----
        if layer == 0:
            d_in = wih.shape[0]
            xp_full = (
                jnp.dot(x.reshape(B * T, d_in), wih,
                        preferred_element_type=jnp.float32)
                + bias
            ).reshape(B, T, 4 * H)
            xp_steps = [xp_full[:, t, :] for t in range(T)]           # each [B, 4H]
        else:
            xp_steps = [
                jnp.dot(h_t, wih, preferred_element_type=jnp.float32) + bias
                for h_t in prev_h_steps
            ]

        # ---- recurrence: fully unrolled, state kept in vregs ----
        h = jnp.zeros((B, H), jnp.float32)
        c = jnp.zeros((B, H), jnp.float32)
        h_sum = jnp.zeros((B, H), jnp.float32)
        h_steps = []

        for t in range(T):
            gates = xp_steps[t] + jnp.dot(h, whh,
                                          preferred_element_type=jnp.float32)  # [B,4H]
            sig = jax.nn.sigmoid(gates)          # one full-width EUP op
            tnh = jnp.tanh(gates)                # one full-width EUP op
            i_g = sig[:, 0 * H:1 * H]
            f_g = sig[:, 1 * H:2 * H]
            g_g = tnh[:, 2 * H:3 * H]
            o_g = sig[:, 3 * H:4 * H]
            c = f_g * c + i_g * g_g
            h = o_g * jnp.tanh(c)
            if is_last:
                if method == "mean":
                    h_sum = h_sum + h
            else:
                h_steps.append(h)

        if is_last:
            feat = h_sum * (1.0 / T) if method == "mean" else h      # [B, H]
        else:
            prev_h_steps = h_steps

    # Dropout(p=0.2) is identity at inference time.
    # TODO(synk): training-mode dropout (random mask) not implemented.

    # ---- MLP head + LogSoftmax ----
    z1 = jnp.dot(feat, fc1w_ref[...], preferred_element_type=jnp.float32) + fc1b_ref[...]
    a = jnp.where(z1 > 0, z1, 0.01 * z1)         # LeakyReLU(0.01)
    z2 = jnp.dot(a, fc2w_ref[...], preferred_element_type=jnp.float32) + fc2b_ref[...]

    m = jnp.max(z2, axis=1, keepdims=True)       # stable log-softmax over classes
    s = z2 - m
    lse = jnp.log(jnp.sum(jnp.exp(s), axis=1, keepdims=True))
    out_ref[...] = s - lse


# ----------------------------- wrapper ---------------------------------------
@functools.partial(jax.jit, static_argnames=("method",))
def model_forward(utterances, params, method=METHOD):
    """utterances: [B, T, mel_channel] (batch_first, like the PyTorch module)."""
    x = utterances.astype(jnp.float32)           # keep batch_first; no transpose
    B = x.shape[0]
    C = params["fc2_w"].shape[1]

    flat_inputs = [x]
    for layer in params["lstm"]:
        flat_inputs += [layer["w_ih_t"], layer["w_hh_t"], layer["bias"]]
    flat_inputs += [params["fc1_w"], params["fc1_b"], params["fc2_w"], params["fc2_b"]]

    kernel = functools.partial(
        fused_lstm_head_kernel, num_layers=len(params["lstm"]), method=method
    )
    return pl.pallas_call(
        kernel,
        out_shape=jax.ShapeDtypeStruct((B, C), jnp.float32),
    )(*flat_inputs)


# ----------------------------- parameter init --------------------------------
def init_params(key):
    params = {"lstm": []}
    H = MODEL_HIDDEN_SIZE
    k = 1.0 / jnp.sqrt(H)
    in_sizes = [MEL_CHANNEL] + [H] * (MODEL_LAYERS - 1)
    for D in in_sizes:
        key, k1, k2, k3, k4 = jax.random.split(key, 5)
        # PyTorch stores [4H, D]; pre-transpose to [D, 4H] for in-kernel matmul.
        w_ih = jax.random.uniform(k1, (4 * H, D), jnp.float32, -k, k)
        w_hh = jax.random.uniform(k2, (4 * H, H), jnp.float32, -k, k)
        b_ih = jax.random.uniform(k3, (4 * H,), jnp.float32, -k, k)
        b_hh = jax.random.uniform(k4, (4 * H,), jnp.float32, -k, k)
        params["lstm"].append(
            {
                "w_ih_t": w_ih.T,
                "w_hh_t": w_hh.T,
                "bias": (b_ih + b_hh).reshape(1, 4 * H),
            }
        )
    # fc: Linear(H,H) -> LeakyReLU -> Linear(H,C); xavier_normal_ weights.
    key, k1, k2, k3, k4 = jax.random.split(key, 5)
    std1 = jnp.sqrt(2.0 / (H + H))
    std2 = jnp.sqrt(2.0 / (H + NUM_CLASSES))
    params["fc1_w"] = jax.random.normal(k1, (H, H), jnp.float32) * std1
    params["fc1_b"] = jax.random.uniform(k2, (1, H), jnp.float32, -k, k)
    params["fc2_w"] = jax.random.normal(k3, (H, NUM_CLASSES), jnp.float32) * std2
    params["fc2_b"] = jax.random.uniform(k4, (1, NUM_CLASSES), jnp.float32, -k, k)
    return params


# ----------------------------- main -------------------------------------------
if __name__ == "__main__":
    key = jax.random.PRNGKey(0)
    key, pkey, xkey = jax.random.split(key, 3)
    params = init_params(pkey)
    utterances = jax.random.normal(xkey, (BATCH, SEQ, MEL_CHANNEL), jnp.float32)

    log_probs = model_forward(utterances, params, method=METHOD)
    jax.block_until_ready(log_probs)

    assert log_probs.shape == (BATCH, NUM_CLASSES)
    # log-softmax rows must (approximately) exponentiate-sum to 1
    row_sums = jnp.sum(jnp.exp(log_probs), axis=1)
    assert bool(jnp.all(jnp.abs(row_sums - 1.0) < 1e-4))

    print("KERNEL_OK")
</pallas_src>

<mosaic_0001>
module attributes {stable_mosaic.version = 11 : i64} {
  func.func @fused_lstm_head_kernel(%arg0: memref<2x8x32xf32, #tpu.memory_space<vmem>>, %arg1: memref<32x128xf32, #tpu.memory_space<vmem>>, %arg2: memref<32x128xf32, #tpu.memory_space<vmem>>, %arg3: memref<1x128xf32, #tpu.memory_space<vmem>>, %arg4: memref<32x128xf32, #tpu.memory_space<vmem>>, %arg5: memref<32x128xf32, #tpu.memory_space<vmem>>, %arg6: memref<1x128xf32, #tpu.memory_space<vmem>>, %arg7: memref<32x32xf32, #tpu.memory_space<vmem>>, %arg8: memref<1x32xf32, #tpu.memory_space<vmem>>, %arg9: memref<32x8xf32, #tpu.memory_space<vmem>>, %arg10: memref<1x8xf32, #tpu.memory_space<vmem>>, %arg11: memref<2x8xf32, #tpu.memory_space<vmem>>) attributes {dimension_semantics = [], scalar_prefetch = 0 : i64, scratch_operands = 0 : i64, tpu.core_type = #tpu.core_type<tc>} {
    %c0 = arith.constant 0 : index
    %c0_0 = arith.constant 0 : index
    %c0_1 = arith.constant 0 : index
    %0 = vector.load %arg0[%c0, %c0_0, %c0_1] : memref<2x8x32xf32, #tpu.memory_space<vmem>>, vector<2x8x32xf32>
    %c0_2 = arith.constant 0 : index
    %c0_3 = arith.constant 0 : index
    %1 = vector.load %arg1[%c0_2, %c0_3] : memref<32x128xf32, #tpu.memory_space<vmem>>, vector<32x128xf32>
    %c0_4 = arith.constant 0 : index
    %c0_5 = arith.constant 0 : index
    %2 = vector.load %arg2[%c0_4, %c0_5] : memref<32x128xf32, #tpu.memory_space<vmem>>, vector<32x128xf32>
    %c0_6 = arith.constant 0 : index
    %c0_7 = arith.constant 0 : index
    %3 = vector.load %arg3[%c0_6, %c0_7] : memref<1x128xf32, #tpu.memory_space<vmem>>, vector<1x128xf32>
    %4 = vector.shape_cast %0 : vector<2x8x32xf32> to vector<16x32xf32>
    %cst = arith.constant dense<0.000000e+00> : vector<16x128xf32>
    %5 = tpu.matmul %4, %1, %cst {dimension_numbers = #tpu.dot_dimension_numbers<[1], [0], [0], [1], [0, 0, 1, 1], [], []>} : vector<16x32xf32>, vector<32x128xf32>, vector<16x128xf32> -> vector<16x128xf32>
    %6 = vector.broadcast %3 : vector<1x128xf32> to vector<16x128xf32>
    %7 = arith.addf %5, %6 : vector<16x128xf32>
    %8 = vector.shape_cast %7 : vector<16x128xf32> to vector<2x8x128xf32>
    %9 = vector.extract_strided_slice %8 {offsets = [0, 0, 0], sizes = [2, 1, 128], strides = [1, 1, 1]} : vector<2x8x128xf32> to vector<2x1x128xf32>
    %10 = vector.shape_cast %9 : vector<2x1x128xf32> to vector<2x128xf32>
    %11 = vector.extract_strided_slice %8 {offsets = [0, 1, 0], sizes = [2, 1, 128], strides = [1, 1, 1]} : vector<2x8x128xf32> to vector<2x1x128xf32>
    %12 = vector.shape_cast %11 : vector<2x1x128xf32> to vector<2x128xf32>
    %13 = vector.extract_strided_slice %8 {offsets = [0, 2, 0], sizes = [2, 1, 128], strides = [1, 1, 1]} : vector<2x8x128xf32> to vector<2x1x128xf32>
    %14 = vector.shape_cast %13 : vector<2x1x128xf32> to vector<2x128xf32>
    %15 = vector.extract_strided_slice %8 {offsets = [0, 3, 0], sizes = [2, 1, 128], strides = [1, 1, 1]} : vector<2x8x128xf32> to vector<2x1x128xf32>
    %16 = vector.shape_cast %15 : vector<2x1x128xf32> to vector<2x128xf32>
    %17 = vector.extract_strided_slice %8 {offsets = [0, 4, 0], sizes = [2, 1, 128], strides = [1, 1, 1]} : vector<2x8x128xf32> to vector<2x1x128xf32>
    %18 = vector.shape_cast %17 : vector<2x1x128xf32> to vector<2x128xf32>
    %19 = vector.extract_strided_slice %8 {offsets = [0, 5, 0], sizes = [2, 1, 128], strides = [1, 1, 1]} : vector<2x8x128xf32> to vector<2x1x128xf32>
    %20 = vector.shape_cast %19 : vector<2x1x128xf32> to vector<2x128xf32>
    %21 = vector.extract_strided_slice %8 {offsets = [0, 6, 0], sizes = [2, 1, 128], strides = [1, 1, 1]} : vector<2x8x128xf32> to vector<2x1x128xf32>
    %22 = vector.shape_cast %21 : vector<2x1x128xf32> to vector<2x128xf32>
    %23 = vector.extract_strided_slice %8 {offsets = [0, 7, 0], sizes = [2, 1, 128], strides = [1, 1, 1]} : vector<2x8x128xf32> to vector<2x1x128xf32>
    %24 = vector.shape_cast %23 : vector<2x1x128xf32> to vector<2x128xf32>
    %cst_8 = arith.constant 0.000000e+00 : f32
    %25 = vector.broadcast %cst_8 : f32 to vector<2x32xf32>
    %cst_9 = arith.constant 0.000000e+00 : f32
    %26 = vector.broadcast %cst_9 : f32 to vector<2x32xf32>
    %cst_10 = arith.constant dense<0.000000e+00> : vector<2x128xf32>
    %27 = tpu.matmul %25, %2, %cst_10 {dimension_numbers = #tpu.dot_dimension_numbers<[1], [0], [0], [1], [0, 0, 1, 1], [], []>} : vector<2x32xf32>, vector<32x128xf32>, vector<2x128xf32> -> vector<2x128xf32>
    %28 = arith.addf %10, %27 : vector<2x128xf32>
    %29 = arith.negf %28 : vector<2x128xf32>
    %30 = math.exp %29 : vector<2x128xf32>
    %cst_11 = arith.constant 1.000000e+00 : f32
    %31 = vector.broadcast %cst_11 : f32 to vector<2x128xf32>
    %32 = arith.addf %31, %30 : vector<2x128xf32>
    %33 = arith.divf %31, %32 : vector<2x128xf32>
    %34 = math.tanh %28 : vector<2x128xf32>
    %35 = vector.extract_strided_slice %33 {offsets = [0, 0], sizes = [2, 32], strides = [1, 1]} : vector<2x128xf32> to vector<2x32xf32>
    %36 = vector.extract_strided_slice %33 {offsets = [0, 32], sizes = [2, 32], strides = [1, 1]} : vector<2x128xf32> to vector<2x32xf32>
    %37 = vector.extract_strided_slice %34 {offsets = [0, 64], sizes = [2, 32], strides = [1, 1]} : vector<2x128xf32> to vector<2x32xf32>
    %38 = vector.extract_strided_slice %33 {offsets = [0, 96], sizes = [2, 32], strides = [1, 1]} : vector<2x128xf32> to vector<2x32xf32>
    %39 = arith.mulf %36, %26 : vector<2x32xf32>
    %40 = arith.mulf %35, %37 : vector<2x32xf32>
    %41 = arith.addf %39, %40 : vector<2x32xf32>
    %42 = math.tanh %41 : vector<2x32xf32>
    %43 = arith.mulf %38, %42 : vector<2x32xf32>
    %cst_12 = arith.constant dense<0.000000e+00> : vector<2x128xf32>
    %44 = tpu.matmul %43, %2, %cst_12 {dimension_numbers = #tpu.dot_dimension_numbers<[1], [0], [0], [1], [0, 0, 1, 1], [], []>} : vector<2x32xf32>, vector<32x128xf32>, vector<2x128xf32> -> vector<2x128xf32>
    %45 = arith.addf %12, %44 : vector<2x128xf32>
    %46 = arith.negf %45 : vector<2x128xf32>
    %47 = math.exp %46 : vector<2x128xf32>
    %cst_13 = arith.constant 1.000000e+00 : f32
    %48 = vector.broadcast %cst_13 : f32 to vector<2x128xf32>
    %49 = arith.addf %48, %47 : vector<2x128xf32>
    %50 = arith.divf %48, %49 : vector<2x128xf32>
    %51 = math.tanh %45 : vector<2x128xf32>
    %52 = vector.extract_strided_slice %50 {offsets = [0, 0], sizes = [2, 32], strides = [1, 1]} : vector<2x128xf32> to vector<2x32xf32>
    %53 = vector.extract_strided_slice %50 {offsets = [0, 32], sizes = [2, 32], strides = [1, 1]} : vector<2x128xf32> to vector<2x32xf32>
    %54 = vector.extract_strided_slice %51 {offsets = [0, 64], sizes = [2, 32], strides = [1, 1]} : vector<2x128xf32> to vector<2x32xf32>
    %55 = vector.extract_strided_slice %50 {offsets = [0, 96], sizes = [2, 32], strides = [1, 1]} : vector<2x128xf32> to vector<2x32xf32>
    %56 = arith.mulf %53, %41 : vector<2x32xf32>
    %57 = arith.mulf %52, %54 : vector<2x32xf32>
    %58 = arith.addf %56, %57 : vector<2x32xf32>
    %59 = math.tanh %58 : vector<2x32xf32>
    %60 = arith.mulf %55, %59 : vector<2x32xf32>
    %cst_14 = arith.constant dense<0.000000e+00> : vector<2x128xf32>
    %61 = tpu.matmul %60, %2, %cst_14 {dimension_numbers = #tpu.dot_dimension_numbers<[1], [0], [0], [1], [0, 0, 1, 1], [], []>} : vector<2x32xf32>, vector<32x128xf32>, vector<2x128xf32> -> vector<2x128xf32>
    %62 = arith.addf %14, %61 : vector<2x128xf32>
    %63 = arith.negf %62 : vector<2x128xf32>
    %64 = math.exp %63 : vector<2x128xf32>
    %cst_15 = arith.constant 1.000000e+00 : f32
    %65 = vector.broadcast %cst_15 : f32 to vector<2x128xf32>
    %66 = arith.addf %65, %64 : vector<2x128xf32>
    %67 = arith.divf %65, %66 : vector<2x128xf32>
    %68 = math.tanh %62 : vector<2x128xf32>
    %69 = vector.extract_strided_slice %67 {offsets = [0, 0], sizes = [2, 32], strides = [1, 1]} : vector<2x128xf32> to vector<2x32xf32>
    %70 = vector.extract_strided_slice %67 {offsets = [0, 32], sizes = [2, 32], strides = [1, 1]} : vector<2x128xf32> to vector<2x32xf32>
    %71 = vector.extract_strided_slice %68 {offsets = [0, 64], sizes = [2, 32], strides = [1, 1]} : vector<2x128xf32> to vector<2x32xf32>
    %72 = vector.extract_strided_slice %67 {offsets = [0, 96], sizes = [2, 32], strides = [1, 1]} : vector<2x128xf32> to vector<2x32xf32>
    %73 = arith.mulf %70, %58 : vector<2x32xf32>
    %74 = arith.mulf %69, %71 : vector<2x32xf32>
    %75 = arith.addf %73, %74 : vector<2x32xf32>
    %76 = math.tanh %75 : vector<2x32xf32>
    %77 = arith.mulf %72, %76 : vector<2x32xf32>
    %cst_16 = arith.constant dense<0.000000e+00> : vector<2x128xf32>
    %78 = tpu.matmul %77, %2, %cst_16 {dimension_numbers = #tpu.dot_dimension_numbers<[1], [0], [0], [1], [0, 0, 1, 1], [], []>} : vector<2x32xf32>, vector<32x128xf32>, vector<2x128xf32> -> vector<2x128xf32>
    %79 = arith.addf %16, %78 : vector<2x128xf32>
    %80 = arith.negf %79 : vector<2x128xf32>
    %81 = math.exp %80 : vector<2x128xf32>
    %cst_17 = arith.constant 1.000000e+00 : f32
    %82 = vector.broadcast %cst_17 : f32 to vector<2x128xf32>
    %83 = arith.addf %82, %81 : vector<2x128xf32>
    %84 = arith.divf %82, %83 : vector<2x128xf32>
    %85 = math.tanh %79 : vector<2x128xf32>
    %86 = vector.extract_strided_slice %84 {offsets = [0, 0], sizes = [2, 32], strides = [1, 1]} : vector<2x128xf32> to vector<2x32xf32>
    %87 = vector.extract_strided_slice %84 {offsets = [0, 32], sizes = [2, 32], strides = [1, 1]} : vector<2x128xf32> to vector<2x32xf32>
    %88 = vector.extract_strided_slice %85 {offsets = [0, 64], sizes = [2, 32], strides = [1, 1]} : vector<2x128xf32> to vector<2x32xf32>
    %89 = vector.extract_strided_slice %84 {offsets = [0, 96], sizes = [2, 32], strides = [1, 1]} : vector<2x128xf32> to vector<2x32xf32>
    %90 = arith.mulf %87, %75 : vector<2x32xf32>
    %91 = arith.mulf %86, %88 : vector<2x32xf32>
    %92 = arith.addf %90, %91 : vector<2x32xf32>
    %93 = math.tanh %92 : vector<2x32xf32>
    %94 = arith.mulf %89, %93 : vector<2x32xf32>
    %cst_18 = arith.constant dense<0.000000e+00> : vector<2x128xf32>
    %95 = tpu.matmul %94, %2, %cst_18 {dimension_numbers = #tpu.dot_dimension_numbers<[1], [0], [0], [1], [0, 0, 1, 1], [], []>} : vector<2x32xf32>, vector<32x128xf32>, vector<2x128xf32> -> vector<2x128xf32>
    %96 = arith.addf %18, %95 : vector<2x128xf32>
    %97 = arith.negf %96 : vector<2x128xf32>
    %98 = math.exp %97 : vector<2x128xf32>
    %cst_19 = arith.constant 1.000000e+00 : f32
    %99 = vector.broadcast %cst_19 : f32 to vector<2x128xf32>
    %100 = arith.addf %99, %98 : vector<2x128xf32>
    %101 = arith.divf %99, %100 : vector<2x128xf32>
    %102 = math.tanh %96 : vector<2x128xf32>
    %103 = vector.extract_strided_slice %101 {offsets = [0, 0], sizes = [2, 32], strides = [1, 1]} : vector<2x128xf32> to vector<2x32xf32>
    %104 = vector.extract_strided_slice %101 {offsets = [0, 32], sizes = [2, 32], strides = [1, 1]} : vector<2x128xf32> to vector<2x32xf32>
    %105 = vector.extract_strided_slice %102 {offsets = [0, 64], sizes = [2, 32], strides = [1, 1]} : vector<2x128xf32> to vector<2x32xf32>
    %106 = vector.extract_strided_slice %101 {offsets = [0, 96], sizes = [2, 32], strides = [1, 1]} : vector<2x128xf32> to vector<2x32xf32>
    %107 = arith.mulf %104, %92 : vector<2x32xf32>
    %108 = arith.mulf %103, %105 : vector<2x32xf32>
    %109 = arith.addf %107, %108 : vector<2x32xf32>
    %110 = math.tanh %109 : vector<2x32xf32>
    %111 = arith.mulf %106, %110 : vector<2x32xf32>
    %cst_20 = arith.constant dense<0.000000e+00> : vector<2x128xf32>
    %112 = tpu.matmul %111, %2, %cst_20 {dimension_numbers = #tpu.dot_dimension_numbers<[1], [0], [0], [1], [0, 0, 1, 1], [], []>} : vector<2x32xf32>, vector<32x128xf32>, vector<2x128xf32> -> vector<2x128xf32>
    %113 = arith.addf %20, %112 : vector<2x128xf32>
    %114 = arith.negf %113 : vector<2x128xf32>
    %115 = math.exp %114 : vector<2x128xf32>
    %cst_21 = arith.constant 1.000000e+00 : f32
    %116 = vector.broadcast %cst_21 : f32 to vector<2x128xf32>
    %117 = arith.addf %116, %115 : vector<2x128xf32>
    %118 = arith.divf %116, %117 : vector<2x128xf32>
    %119 = math.tanh %113 : vector<2x128xf32>
    %120 = vector.extract_strided_slice %118 {offsets = [0, 0], sizes = [2, 32], strides = [1, 1]} : vector<2x128xf32> to vector<2x32xf32>
    %121 = vector.extract_strided_slice %118 {offsets = [0, 32], sizes = [2, 32], strides = [1, 1]} : vector<2x128xf32> to vector<2x32xf32>
    %122 = vector.extract_strided_slice %119 {offsets = [0, 64], sizes = [2, 32], strides = [1, 1]} : vector<2x128xf32> to vector<2x32xf32>
    %123 = vector.extract_strided_slice %118 {offsets = [0, 96], sizes = [2, 32], strides = [1, 1]} : vector<2x128xf32> to vector<2x32xf32>
    %124 = arith.mulf %121, %109 : vector<2x32xf32>
    %125 = arith.mulf %120, %122 : vector<2x32xf32>
    %126 = arith.addf %124, %125 : vector<2x32xf32>
    %127 = math.tanh %126 : vector<2x32xf32>
    %128 = arith.mulf %123, %127 : vector<2x32xf32>
    %cst_22 = arith.constant dense<0.000000e+00> : vector<2x128xf32>
    %129 = tpu.matmul %128, %2, %cst_22 {dimension_numbers = #tpu.dot_dimension_numbers<[1], [0], [0], [1], [0, 0, 1, 1], [], []>} : vector<2x32xf32>, vector<32x128xf32>, vector<2x128xf32> -> vector<2x128xf32>
    %130 = arith.addf %22, %129 : vector<2x128xf32>
    %131 = arith.negf %130 : vector<2x128xf32>
    %132 = math.exp %131 : vector<2x128xf32>
    %cst_23 = arith.constant 1.000000e+00 : f32
    %133 = vector.broadcast %cst_23 : f32 to vector<2x128xf32>
    %134 = arith.addf %133, %132 : vector<2x128xf32>
    %135 = arith.divf %133, %134 : vector<2x128xf32>
    %136 = math.tanh %130 : vector<2x128xf32>
    %137 = vector.extract_strided_slice %135 {offsets = [0, 0], sizes = [2, 32], strides = [1, 1]} : vector<2x128xf32> to vector<2x32xf32>
    %138 = vector.extract_strided_slice %135 {offsets = [0, 32], sizes = [2, 32], strides = [1, 1]} : vector<2x128xf32> to vector<2x32xf32>
    %139 = vector.extract_strided_slice %136 {offsets = [0, 64], sizes = [2, 32], strides = [1, 1]} : vector<2x128xf32> to vector<2x32xf32>
    %140 = vector.extract_strided_slice %135 {offsets = [0, 96], sizes = [2, 32], strides = [1, 1]} : vector<2x128xf32> to vector<2x32xf32>
    %141 = arith.mulf %138, %126 : vector<2x32xf32>
    %142 = arith.mulf %137, %139 : vector<2x32xf32>
    %143 = arith.addf %141, %142 : vector<2x32xf32>
    %144 = math.tanh %143 : vector<2x32xf32>
    %145 = arith.mulf %140, %144 : vector<2x32xf32>
    %cst_24 = arith.constant dense<0.000000e+00> : vector<2x128xf32>
    %146 = tpu.matmul %145, %2, %cst_24 {dimension_numbers = #tpu.dot_dimension_numbers<[1], [0], [0], [1], [0, 0, 1, 1], [], []>} : vector<2x32xf32>, vector<32x128xf32>, vector<2x128xf32> -> vector<2x128xf32>
    %147 = arith.addf %24, %146 : vector<2x128xf32>
    %148 = arith.negf %147 : vector<2x128xf32>
    %149 = math.exp %148 : vector<2x128xf32>
    %cst_25 = arith.constant 1.000000e+00 : f32
    %150 = vector.broadcast %cst_25 : f32 to vector<2x128xf32>
    %151 = arith.addf %150, %149 : vector<2x128xf32>
    %152 = arith.divf %150, %151 : vector<2x128xf32>
    %153 = math.tanh %147 : vector<2x128xf32>
    %154 = vector.extract_strided_slice %152 {offsets = [0, 0], sizes = [2, 32], strides = [1, 1]} : vector<2x128xf32> to vector<2x32xf32>
    %155 = vector.extract_strided_slice %152 {offsets = [0, 32], sizes = [2, 32], strides = [1, 1]} : vector<2x128xf32> to vector<2x32xf32>
    %156 = vector.extract_strided_slice %153 {offsets = [0, 64], sizes = [2, 32], strides = [1, 1]} : vector<2x128xf32> to vector<2x32xf32>
    %157 = vector.extract_strided_slice %152 {offsets = [0, 96], sizes = [2, 32], strides = [1, 1]} : vector<2x128xf32> to vector<2x32xf32>
    %158 = arith.mulf %155, %143 : vector<2x32xf32>
    %159 = arith.mulf %154, %156 : vector<2x32xf32>
    %160 = arith.addf %158, %159 : vector<2x32xf32>
    %161 = math.tanh %160 : vector<2x32xf32>
    %162 = arith.mulf %157, %161 : vector<2x32xf32>
    %c0_26 = arith.constant 0 : index
    %c0_27 = arith.constant 0 : index
    %163 = vector.load %arg4[%c0_26, %c0_27] : memref<32x128xf32, #tpu.memory_space<vmem>>, vector<32x128xf32>
    %c0_28 = arith.constant 0 : index
    %c0_29 = arith.constant 0 : index
    %164 = vector.load %arg5[%c0_28, %c0_29] : memref<32x128xf32, #tpu.memory_space<vmem>>, vector<32x128xf32>
    %c0_30 = arith.constant 0 : index
    %c0_31 = arith.constant 0 : index
    %165 = vector.load %arg6[%c0_30, %c0_31] : memref<1x128xf32, #tpu.memory_space<vmem>>, vector<1x128xf32>
    %cst_32 = arith.constant dense<0.000000e+00> : vector<2x128xf32>
    %166 = tpu.matmul %43, %163, %cst_32 {dimension_numbers = #tpu.dot_dimension_numbers<[1], [0], [0], [1], [0, 0, 1, 1], [], []>} : vector<2x32xf32>, vector<32x128xf32>, vector<2x128xf32> -> vector<2x128xf32>
    %167 = vector.broadcast %165 : vector<1x128xf32> to vector<2x128xf32>
    %168 = arith.addf %166, %167 : vector<2x128xf32>
    %cst_33 = arith.constant dense<0.000000e+00> : vector<2x128xf32>
    %169 = tpu.matmul %60, %163, %cst_33 {dimension_numbers = #tpu.dot_dimension_numbers<[1], [0], [0], [1], [0, 0, 1, 1], [], []>} : vector<2x32xf32>, vector<32x128xf32>, vector<2x128xf32> -> vector<2x128xf32>
    %170 = vector.broadcast %165 : vector<1x128xf32> to vector<2x128xf32>
    %171 = arith.addf %169, %170 : vector<2x128xf32>
    %cst_34 = arith.constant dense<0.000000e+00> : vector<2x128xf32>
    %172 = tpu.matmul %77, %163, %cst_34 {dimension_numbers = #tpu.dot_dimension_numbers<[1], [0], [0], [1], [0, 0, 1, 1], [], []>} : vector<2x32xf32>, vector<32x128xf32>, vector<2x128xf32> -> vector<2x128xf32>
    %173 = vector.broadcast %165 : vector<1x128xf32> to vector<2x128xf32>
    %174 = arith.addf %172, %173 : vector<2x128xf32>
    %cst_35 = arith.constant dense<0.000000e+00> : vector<2x128xf32>
    %175 = tpu.matmul %94, %163, %cst_35 {dimension_numbers = #tpu.dot_dimension_numbers<[1], [0], [0], [1], [0, 0, 1, 1], [], []>} : vector<2x32xf32>, vector<32x128xf32>, vector<2x128xf32> -> vector<2x128xf32>
    %176 = vector.broadcast %165 : vector<1x128xf32> to vector<2x128xf32>
    %177 = arith.addf %175, %176 : vector<2x128xf32>
    %cst_36 = arith.constant dense<0.000000e+00> : vector<2x128xf32>
    %178 = tpu.matmul %111, %163, %cst_36 {dimension_numbers = #tpu.dot_dimension_numbers<[1], [0], [0], [1], [0, 0, 1, 1], [], []>} : vector<2x32xf32>, vector<32x128xf32>, vector<2x128xf32> -> vector<2x128xf32>
    %179 = vector.broadcast %165 : vector<1x128xf32> to vector<2x128xf32>
    %180 = arith.addf %178, %179 : vector<2x128xf32>
    %cst_37 = arith.constant dense<0.000000e+00> : vector<2x128xf32>
    %181 = tpu.matmul %128, %163, %cst_37 {dimension_numbers = #tpu.dot_dimension_numbers<[1], [0], [0], [1], [0, 0, 1, 1], [], []>} : vector<2x32xf32>, vector<32x128xf32>, vector<2x128xf32> -> vector<2x128xf32>
    %182 = vector.broadcast %165 : vector<1x128xf32> to vector<2x128xf32>
    %183 = arith.addf %181, %182 : vector<2x128xf32>
    %cst_38 = arith.constant dense<0.000000e+00> : vector<2x128xf32>
    %184 = tpu.matmul %145, %163, %cst_38 {dimension_numbers = #tpu.dot_dimension_numbers<[1], [0], [0], [1], [0, 0, 1, 1], [], []>} : vector<2x32xf32>, vector<32x128xf32>, vector<2x128xf32> -> vector<2x128xf32>
    %185 = vector.broadcast %165 : vector<1x128xf32> to vector<2x128xf32>
    %186 = arith.addf %184, %185 : vector<2x128xf32>
    %cst_39 = arith.constant dense<0.000000e+00> : vector<2x128xf32>
    %187 = tpu.matmul %162, %163, %cst_39 {dimension_numbers = #tpu.dot_dimension_numbers<[1], [0], [0], [1], [0, 0, 1, 1], [], []>} : vector<2x32xf32>, vector<32x128xf32>, vector<2x128xf32> -> vector<2x128xf32>
    %188 = vector.broadcast %165 : vector<1x128xf32> to vector<2x128xf32>
    %189 = arith.addf %187, %188 : vector<2x128xf32>
    %cst_40 = arith.constant 0.000000e+00 : f32
    %190 = vector.broadcast %cst_40 : f32 to vector<2x32xf32>
    %cst_41 = arith.constant 0.000000e+00 : f32
    %191 = vector.broadcast %cst_41 : f32 to vector<2x32xf32>
    %cst_42 = arith.constant 0.000000e+00 : f32
    %192 = vector.broadcast %cst_42 : f32 to vector<2x32xf32>
    %cst_43 = arith.constant dense<0.000000e+00> : vector<2x128xf32>
    %193 = tpu.matmul %190, %164, %cst_43 {dimension_numbers = #tpu.dot_dimension_numbers<[1], [0], [0], [1], [0, 0, 1, 1], [], []>} : vector<2x32xf32>, vector<32x128xf32>, vector<2x128xf32> -> vector<2x128xf32>
    %194 = arith.addf %168, %193 : vector<2x128xf32>
    %195 = arith.negf %194 : vector<2x128xf32>
    %196 = math.exp %195 : vector<2x128xf32>
    %cst_44 = arith.constant 1.000000e+00 : f32
    %197 = vector.broadcast %cst_44 : f32 to vector<2x128xf32>
    %198 = arith.addf %197, %196 : vector<2x128xf32>
    %199 = arith.divf %197, %198 : vector<2x128xf32>
    %200 = math.tanh %194 : vector<2x128xf32>
    %201 = vector.extract_strided_slice %199 {offsets = [0, 0], sizes = [2, 32], strides = [1, 1]} : vector<2x128xf32> to vector<2x32xf32>
    %202 = vector.extract_strided_slice %199 {offsets = [0, 32], sizes = [2, 32], strides = [1, 1]} : vector<2x128xf32> to vector<2x32xf32>
    %203 = vector.extract_strided_slice %200 {offsets = [0, 64], sizes = [2, 32], strides = [1, 1]} : vector<2x128xf32> to vector<2x32xf32>
    %204 = vector.extract_strided_slice %199 {offsets = [0, 96], sizes = [2, 32], strides = [1, 1]} : vector<2x128xf32> to vector<2x32xf32>
    %205 = arith.mulf %202, %191 : vector<2x32xf32>
    %206 = arith.mulf %201, %203 : vector<2x32xf32>
    %207 = arith.addf %205, %206 : vector<2x32xf32>
    %208 = math.tanh %207 : vector<2x32xf32>
    %209 = arith.mulf %204, %208 : vector<2x32xf32>
    %210 = arith.addf %192, %209 : vector<2x32xf32>
    %cst_45 = arith.constant dense<0.000000e+00> : vector<2x128xf32>
    %211 = tpu.matmul %209, %164, %cst_45 {dimension_numbers = #tpu.dot_dimension_numbers<[1], [0], [0], [1], [0, 0, 1, 1], [], []>} : vector<2x32xf32>, vector<32x128xf32>, vector<2x128xf32> -> vector<2x128xf32>
    %212 = arith.addf %171, %211 : vector<2x128xf32>
    %213 = arith.negf %212 : vector<2x128xf32>
    %214 = math.exp %213 : vector<2x128xf32>
    %cst_46 = arith.constant 1.000000e+00 : f32
    %215 = vector.broadcast %cst_46 : f32 to vector<2x128xf32>
    %216 = arith.addf %215, %214 : vector<2x128xf32>
    %217 = arith.divf %215, %216 : vector<2x128xf32>
    %218 = math.tanh %212 : vector<2x128xf32>
    %219 = vector.extract_strided_slice %217 {offsets = [0, 0], sizes = [2, 32], strides = [1, 1]} : vector<2x128xf32> to vector<2x32xf32>
    %220 = vector.extract_strided_slice %217 {offsets = [0, 32], sizes = [2, 32], strides = [1, 1]} : vector<2x128xf32> to vector<2x32xf32>
    %221 = vector.extract_strided_slice %218 {offsets = [0, 64], sizes = [2, 32], strides = [1, 1]} : vector<2x128xf32> to vector<2x32xf32>
    %222 = vector.extract_strided_slice %217 {offsets = [0, 96], sizes = [2, 32], strides = [1, 1]} : vector<2x128xf32> to vector<2x32xf32>
    %223 = arith.mulf %220, %207 : vector<2x32xf32>
    %224 = arith.mulf %219, %221 : vector<2x32xf32>
    %225 = arith.addf %223, %224 : vector<2x32xf32>
    %226 = math.tanh %225 : vector<2x32xf32>
    %227 = arith.mulf %222, %226 : vector<2x32xf32>
    %228 = arith.addf %210, %227 : vector<2x32xf32>
    %cst_47 = arith.constant dense<0.000000e+00> : vector<2x128xf32>
    %229 = tpu.matmul %227, %164, %cst_47 {dimension_numbers = #tpu.dot_dimension_numbers<[1], [0], [0], [1], [0, 0, 1, 1], [], []>} : vector<2x32xf32>, vector<32x128xf32>, vector<2x128xf32> -> vector<2x128xf32>
    %230 = arith.addf %174, %229 : vector<2x128xf32>
    %231 = arith.negf %230 : vector<2x128xf32>
    %232 = math.exp %231 : vector<2x128xf32>
    %cst_48 = arith.constant 1.000000e+00 : f32
    %233 = vector.broadcast %cst_48 : f32 to vector<2x128xf32>
    %234 = arith.addf %233, %232 : vector<2x128xf32>
    %235 = arith.divf %233, %234 : vector<2x128xf32>
    %236 = math.tanh %230 : vector<2x128xf32>
    %237 = vector.extract_strided_slice %235 {offsets = [0, 0], sizes = [2, 32], strides = [1, 1]} : vector<2x128xf32> to vector<2x32xf32>
    %238 = vector.extract_strided_slice %235 {offsets = [0, 32], sizes = [2, 32], strides = [1, 1]} : vector<2x128xf32> to vector<2x32xf32>
    %239 = vector.extract_strided_slice %236 {offsets = [0, 64], sizes = [2, 32], strides = [1, 1]} : vector<2x128xf32> to vector<2x32xf32>
    %240 = vector.extract_strided_slice %235 {offsets = [0, 96], sizes = [2, 32], strides = [1, 1]} : vector<2x128xf32> to vector<2x32xf32>
    %241 = arith.mulf %238, %225 : vector<2x32xf32>
    %242 = arith.mulf %237, %239 : vector<2x32xf32>
    %243 = arith.addf %241, %242 : vector<2x32xf32>
    %244 = math.tanh %243 : vector<2x32xf32>
    %245 = arith.mulf %240, %244 : vector<2x32xf32>
    %246 = arith.addf %228, %245 : vector<2x32xf32>
    %cst_49 = arith.constant dense<0.000000e+00> : vector<2x128xf32>
    %247 = tpu.matmul %245, %164, %cst_49 {dimension_numbers = #tpu.dot_dimension_numbers<[1], [0], [0], [1], [0, 0, 1, 1], [], []>} : vector<2x32xf32>, vector<32x128xf32>, vector<2x128xf32> -> vector<2x128xf32>
    %248 = arith.addf %177, %247 : vector<2x128xf32>
    %249 = arith.negf %248 : vector<2x128xf32>
    %250 = math.exp %249 : vector<2x128xf32>
    %cst_50 = arith.constant 1.000000e+00 : f32
    %251 = vector.broadcast %cst_50 : f32 to vector<2x128xf32>
    %252 = arith.addf %251, %250 : vector<2x128xf32>
    %253 = arith.divf %251, %252 : vector<2x128xf32>
    %254 = math.tanh %248 : vector<2x128xf32>
    %255 = vector.extract_strided_slice %253 {offsets = [0, 0], sizes = [2, 32], strides = [1, 1]} : vector<2x128xf32> to vector<2x32xf32>
    %256 = vector.extract_strided_slice %253 {offsets = [0, 32], sizes = [2, 32], strides = [1, 1]} : vector<2x128xf32> to vector<2x32xf32>
    %257 = vector.extract_strided_slice %254 {offsets = [0, 64], sizes = [2, 32], strides = [1, 1]} : vector<2x128xf32> to vector<2x32xf32>
    %258 = vector.extract_strided_slice %253 {offsets = [0, 96], sizes = [2, 32], strides = [1, 1]} : vector<2x128xf32> to vector<2x32xf32>
    %259 = arith.mulf %256, %243 : vector<2x32xf32>
    %260 = arith.mulf %255, %257 : vector<2x32xf32>
    %261 = arith.addf %259, %260 : vector<2x32xf32>
    %262 = math.tanh %261 : vector<2x32xf32>
    %263 = arith.mulf %258, %262 : vector<2x32xf32>
    %264 = arith.addf %246, %263 : vector<2x32xf32>
    %cst_51 = arith.constant dense<0.000000e+00> : vector<2x128xf32>
    %265 = tpu.matmul %263, %164, %cst_51 {dimension_numbers = #tpu.dot_dimension_numbers<[1], [0], [0], [1], [0, 0, 1, 1], [], []>} : vector<2x32xf32>, vector<32x128xf32>, vector<2x128xf32> -> vector<2x128xf32>
    %266 = arith.addf %180, %265 : vector<2x128xf32>
    %267 = arith.negf %266 : vector<2x128xf32>
    %268 = math.exp %267 : vector<2x128xf32>
    %cst_52 = arith.constant 1.000000e+00 : f32
    %269 = vector.broadcast %cst_52 : f32 to vector<2x128xf32>
    %270 = arith.addf %269, %268 : vector<2x128xf32>
    %271 = arith.divf %269, %270 : vector<2x128xf32>
    %272 = math.tanh %266 : vector<2x128xf32>
    %273 = vector.extract_strided_slice %271 {offsets = [0, 0], sizes = [2, 32], strides = [1, 1]} : vector<2x128xf32> to vector<2x32xf32>
    %274 = vector.extract_strided_slice %271 {offsets = [0, 32], sizes = [2, 32], strides = [1, 1]} : vector<2x128xf32> to vector<2x32xf32>
    %275 = vector.extract_strided_slice %272 {offsets = [0, 64], sizes = [2, 32], strides = [1, 1]} : vector<2x128xf32> to vector<2x32xf32>
    %276 = vector.extract_strided_slice %271 {offsets = [0, 96], sizes = [2, 32], strides = [1, 1]} : vector<2x128xf32> to vector<2x32xf32>
    %277 = arith.mulf %274, %261 : vector<2x32xf32>
    %278 = arith.mulf %273, %275 : vector<2x32xf32>
    %279 = arith.addf %277, %278 : vector<2x32xf32>
    %280 = math.tanh %279 : vector<2x32xf32>
    %281 = arith.mulf %276, %280 : vector<2x32xf32>
    %282 = arith.addf %264, %281 : vector<2x32xf32>
    %cst_53 = arith.constant dense<0.000000e+00> : vector<2x128xf32>
    %283 = tpu.matmul %281, %164, %cst_53 {dimension_numbers = #tpu.dot_dimension_numbers<[1], [0], [0], [1], [0, 0, 1, 1], [], []>} : vector<2x32xf32>, vector<32x128xf32>, vector<2x128xf32> -> vector<2x128xf32>
    %284 = arith.addf %183, %283 : vector<2x128xf32>
    %285 = arith.negf %284 : vector<2x128xf32>
    %286 = math.exp %285 : vector<2x128xf32>
    %cst_54 = arith.constant 1.000000e+00 : f32
    %287 = vector.broadcast %cst_54 : f32 to vector<2x128xf32>
    %288 = arith.addf %287, %286 : vector<2x128xf32>
    %289 = arith.divf %287, %288 : vector<2x128xf32>
    %290 = math.tanh %284 : vector<2x128xf32>
    %291 = vector.extract_strided_slice %289 {offsets = [0, 0], sizes = [2, 32], strides = [1, 1]} : vector<2x128xf32> to vector<2x32xf32>
    %292 = vector.extract_strided_slice %289 {offsets = [0, 32], sizes = [2, 32], strides = [1, 1]} : vector<2x128xf32> to vector<2x32xf32>
    %293 = vector.extract_strided_slice %290 {offsets = [0, 64], sizes = [2, 32], strides = [1, 1]} : vector<2x128xf32> to vector<2x32xf32>
    %294 = vector.extract_strided_slice %289 {offsets = [0, 96], sizes = [2, 32], strides = [1, 1]} : vector<2x128xf32> to vector<2x32xf32>
    %295 = arith.mulf %292, %279 : vector<2x32xf32>
    %296 = arith.mulf %291, %293 : vector<2x32xf32>
    %297 = arith.addf %295, %296 : vector<2x32xf32>
    %298 = math.tanh %297 : vector<2x32xf32>
    %299 = arith.mulf %294, %298 : vector<2x32xf32>
    %300 = arith.addf %282, %299 : vector<2x32xf32>
    %cst_55 = arith.constant dense<0.000000e+00> : vector<2x128xf32>
    %301 = tpu.matmul %299, %164, %cst_55 {dimension_numbers = #tpu.dot_dimension_numbers<[1], [0], [0], [1], [0, 0, 1, 1], [], []>} : vector<2x32xf32>, vector<32x128xf32>, vector<2x128xf32> -> vector<2x128xf32>
    %302 = arith.addf %186, %301 : vector<2x128xf32>
    %303 = arith.negf %302 : vector<2x128xf32>
    %304 = math.exp %303 : vector<2x128xf32>
    %cst_56 = arith.constant 1.000000e+00 : f32
    %305 = vector.broadcast %cst_56 : f32 to vector<2x128xf32>
    %306 = arith.addf %305, %304 : vector<2x128xf32>
    %307 = arith.divf %305, %306 : vector<2x128xf32>
    %308 = math.tanh %302 : vector<2x128xf32>
    %309 = vector.extract_strided_slice %307 {offsets = [0, 0], sizes = [2, 32], strides = [1, 1]} : vector<2x128xf32> to vector<2x32xf32>
    %310 = vector.extract_strided_slice %307 {offsets = [0, 32], sizes = [2, 32], strides = [1, 1]} : vector<2x128xf32> to vector<2x32xf32>
    %311 = vector.extract_strided_slice %308 {offsets = [0, 64], sizes = [2, 32], strides = [1, 1]} : vector<2x128xf32> to vector<2x32xf32>
    %312 = vector.extract_strided_slice %307 {offsets = [0, 96], sizes = [2, 32], strides = [1, 1]} : vector<2x128xf32> to vector<2x32xf32>
    %313 = arith.mulf %310, %297 : vector<2x32xf32>
    %314 = arith.mulf %309, %311 : vector<2x32xf32>
    %315 = arith.addf %313, %314 : vector<2x32xf32>
    %316 = math.tanh %315 : vector<2x32xf32>
    %317 = arith.mulf %312, %316 : vector<2x32xf32>
    %318 = arith.addf %300, %317 : vector<2x32xf32>
    %cst_57 = arith.constant dense<0.000000e+00> : vector<2x128xf32>
    %319 = tpu.matmul %317, %164, %cst_57 {dimension_numbers = #tpu.dot_dimension_numbers<[1], [0], [0], [1], [0, 0, 1, 1], [], []>} : vector<2x32xf32>, vector<32x128xf32>, vector<2x128xf32> -> vector<2x128xf32>
    %320 = arith.addf %189, %319 : vector<2x128xf32>
    %321 = arith.negf %320 : vector<2x128xf32>
    %322 = math.exp %321 : vector<2x128xf32>
    %cst_58 = arith.constant 1.000000e+00 : f32
    %323 = vector.broadcast %cst_58 : f32 to vector<2x128xf32>
    %324 = arith.addf %323, %322 : vector<2x128xf32>
    %325 = arith.divf %323, %324 : vector<2x128xf32>
    %326 = math.tanh %320 : vector<2x128xf32>
    %327 = vector.extract_strided_slice %325 {offsets = [0, 0], sizes = [2, 32], strides = [1, 1]} : vector<2x128xf32> to vector<2x32xf32>
    %328 = vector.extract_strided_slice %325 {offsets = [0, 32], sizes = [2, 32], strides = [1, 1]} : vector<2x128xf32> to vector<2x32xf32>
    %329 = vector.extract_strided_slice %326 {offsets = [0, 64], sizes = [2, 32], strides = [1, 1]} : vector<2x128xf32> to vector<2x32xf32>
    %330 = vector.extract_strided_slice %325 {offsets = [0, 96], sizes = [2, 32], strides = [1, 1]} : vector<2x128xf32> to vector<2x32xf32>
    %331 = arith.mulf %328, %315 : vector<2x32xf32>
    %332 = arith.mulf %327, %329 : vector<2x32xf32>
    %333 = arith.addf %331, %332 : vector<2x32xf32>
    %334 = math.tanh %333 : vector<2x32xf32>
    %335 = arith.mulf %330, %334 : vector<2x32xf32>
    %336 = arith.addf %318, %335 : vector<2x32xf32>
    %cst_59 = arith.constant 1.250000e-01 : f32
    %337 = vector.broadcast %cst_59 : f32 to vector<2x32xf32>
    %338 = arith.mulf %336, %337 : vector<2x32xf32>
    %c0_60 = arith.constant 0 : index
    %c0_61 = arith.constant 0 : index
    %339 = vector.load %arg7[%c0_60, %c0_61] : memref<32x32xf32, #tpu.memory_space<vmem>>, vector<32x32xf32>
    %cst_62 = arith.constant dense<0.000000e+00> : vector<2x32xf32>
    %340 = tpu.matmul %338, %339, %cst_62 {dimension_numbers = #tpu.dot_dimension_numbers<[1], [0], [0], [1], [0, 0, 1, 1], [], []>} : vector<2x32xf32>, vector<32x32xf32>, vector<2x32xf32> -> vector<2x32xf32>
    %c0_63 = arith.constant 0 : index
    %c0_64 = arith.constant 0 : index
    %341 = vector.load %arg8[%c0_63, %c0_64] : memref<1x32xf32, #tpu.memory_space<vmem>>, vector<1x32xf32>
    %342 = vector.broadcast %341 : vector<1x32xf32> to vector<2x32xf32>
    %343 = arith.addf %340, %342 : vector<2x32xf32>
    %cst_65 = arith.constant 0.000000e+00 : f32
    %344 = vector.broadcast %cst_65 : f32 to vector<2x32xf32>
    %345 = arith.cmpf ogt, %343, %344 : vector<2x32xf32>
    %cst_66 = arith.constant 0.00999999977 : f32
    %346 = vector.broadcast %cst_66 : f32 to vector<2x32xf32>
    %347 = arith.mulf %346, %343 : vector<2x32xf32>
    %348 = arith.select %345, %343, %347 : vector<2x32xi1>, vector<2x32xf32>
    %c0_67 = arith.constant 0 : index
    %c0_68 = arith.constant 0 : index
    %349 = vector.load %arg9[%c0_67, %c0_68] : memref<32x8xf32, #tpu.memory_space<vmem>>, vector<32x8xf32>
    %cst_69 = arith.constant dense<0.000000e+00> : vector<2x8xf32>
    %350 = tpu.matmul %348, %349, %cst_69 {dimension_numbers = #tpu.dot_dimension_numbers<[1], [0], [0], [1], [0, 0, 1, 1], [], []>} : vector<2x32xf32>, vector<32x8xf32>, vector<2x8xf32> -> vector<2x8xf32>
    %c0_70 = arith.constant 0 : index
    %c0_71 = arith.constant 0 : index
    %351 = vector.load %arg10[%c0_70, %c0_71] : memref<1x8xf32, #tpu.memory_space<vmem>>, vector<1x8xf32>
    %352 = vector.broadcast %351 : vector<1x8xf32> to vector<2x8xf32>
    %353 = arith.addf %350, %352 : vector<2x8xf32>
    %cst_72 = arith.constant dense<0xFF800000> : vector<2xf32>
    %354 = vector.multi_reduction <maximumf>, %353, %cst_72 [1] : vector<2x8xf32> to vector<2xf32>
    %355 = vector.shape_cast %354 : vector<2xf32> to vector<2x1xf32>
    %356 = vector.broadcast %355 : vector<2x1xf32> to vector<2x8xf32>
    %357 = arith.subf %353, %356 : vector<2x8xf32>
    %358 = math.exp %357 : vector<2x8xf32>
    %cst_73 = arith.constant dense<0.000000e+00> : vector<2xf32>
    %359 = vector.multi_reduction <add>, %358, %cst_73 [1] : vector<2x8xf32> to vector<2xf32>
    %360 = vector.shape_cast %359 : vector<2xf32> to vector<2x1xf32>
    %361 = math.log %360 : vector<2x1xf32>
    %362 = vector.broadcast %361 : vector<2x1xf32> to vector<2x8xf32>
    %363 = arith.subf %357, %362 : vector<2x8xf32>
    %c0_74 = arith.constant 0 : index
    %c0_75 = arith.constant 0 : index
    %364 = vector.load %arg11[%c0_74, %c0_75] : memref<2x8xf32, #tpu.memory_space<vmem>>, vector<2x8xf32>
    tpu.vector_store %arg11[%c0_74, %c0_75], %363 {strides = array<i32>} : memref<2x8xf32, #tpu.memory_space<vmem>>, vector<2x8xf32>,
    return
  }
}

</mosaic_0001>

<bundles_post_ra>
// kernel: model_forward.1
= control target key start
LH: loop header
LB: loop body
LE: loop exit
PB: predicated region body
PF: predicated region fallthrough
CT: control target
= control target key end

     0   :  { %16 = vsyncpa [#allocation3], 0  ;;  %s4333_s0 = inlined_call_operand.vmem [shape: f32[2,8,32], index: 0, kind: input, shape index: {}]   ;;  %s4334_s1 = inlined_call_operand.vmem [shape: f32[32,128], index: 1, kind: input, shape index: {}]   ;;  %s4335_s2 = inlined_call_operand.hbm [shape: f32[32,128], index: 2, kind: input, shape index: {}]   ;;  %s4336_s3 = inlined_call_operand.vmem [shape: f32[1,128], index: 3, kind: input, shape index: {}]   ;;  %s4337_s4 = inlined_call_operand.hbm [shape: f32[32,128], index: 4, kind: input, shape index: {}]   ;;  %s4338_s5 = inlined_call_operand.hbm [shape: f32[32,128], index: 5, kind: input, shape index: {}]   ;;  %s4339_s6 = inlined_call_operand.vmem [shape: f32[1,128], index: 6, kind: input, shape index: {}]   ;;  %s4340_s7 = inlined_call_operand.hbm [shape: f32[32,32], index: 7, kind: input, shape index: {}]   ;;  %s4341_s8 = inlined_call_operand.vmem [shape: f32[1,32], index: 8, kind: input, shape index: {}]   ;;  %s4342_s9 = inlined_call_operand.vmem [shape: f32[32,8], index: 9, kind: input, shape index: {}]   ;;  %s4343_s10 = inlined_call_operand.vmem [shape: f32[1,8], index: 10, kind: input, shape index: {}]   ;;  %s4344_s11 = inlined_call_operand.hbm [shape: f32[2,8], index: 11, kind: output, shape index: {}]  }
   0x1   :  { %17 = vsyncpa [#allocation6], 0 }
   0x2   :  { %18 = vsyncpa [#allocation9], 0 }
   0x3   :  { %19 = vsyncpa [#allocation4], 0  ;;  %s3692_s17 = smov [#allocation5]   ;;  %s3693_s19 = smov [#allocation2]  }
   0x4   :  { %s43_s18 = sshll.u32 %s3692_s17, 4  ;;  %s29_s20 = sshll.u32 %s3693_s19, 4  ;;  %s44_s18 = int_to_ptr.vmem [resolvable:$true] %s43_s18  ;;  %s30_s20 = int_to_ptr.vmem [resolvable:$true] %s29_s20 }
   0x5   :  { %s3592_s21 = scalar_lea.vmem %s44_s18, 512  ;;  %p3597_p1 = scmp.lt.s32.totalorder %s44_s18, %s44_s18 }
   0x6   :  { %p3593_p0 = scmp.ne.s32.totalorder %s44_s18, %s3592_s21  ;;  %p3598_p2 = scmp.lt.s32.totalorder %s3592_s21, %s3592_s21 }
   0x8   :  { %p3599_p3 = por %p3598_p2, %p3597_p1 }
   0xa   :  { %p3600_p4 = pnand %p3599_p3, %p3593_p0 }
   0xc   :  { %3603 = shalt.err (!%p3600_p4)
}
   0xd   :  { %s3694_s22 = smov 128   ;;  %s3695_s23 = smov 8  }
   0xe   :  { %49 = dma.hbm_to_vmem [thread:$0]  %s4337_s4, 512, %s44_s18, [#allocation6], %s3694_s22, %s3694_s22, %s3695_s23  }
   0xf   :  { %s3612_s26 = scalar_lea.vmem %s30_s20, 512  ;;  %p3617_p6 = scmp.lt.s32.totalorder %s30_s20, %s30_s20 }
  0x10   :  { %p3613_p5 = scmp.ne.s32.totalorder %s30_s20, %s3612_s26  ;;  %p3618_p7 = scmp.lt.s32.totalorder %s3612_s26, %s3612_s26 }
  0x12   :  { %p3619_p8 = por %p3618_p7, %p3617_p6 }
  0x14   :  { %p3620_p9 = pnand %p3619_p8, %p3613_p5 }
  0x16   :  { %3623 = shalt.err (!%p3620_p9)
}
  0x17   :  { %35 = dma.hbm_to_vmem [thread:$0]  %s4335_s2, 512, %s30_s20, [#allocation3], %s3694_s22, %s3694_s22, %s3695_s23  }
  0x18   :  { %s3696_s29 = smov [#allocation7]   ;;  %s3697_s12 = smov [#allocation8]  }
  0x19   :  { %s55_s30 = sshll.u32 %s3696_s29, 4  ;;  %s69_s13 = sshll.u32 %s3697_s12, 4  ;;  %s56_s30 = int_to_ptr.vmem [resolvable:$true] %s55_s30  ;;  %s70_s13 = int_to_ptr.vmem [resolvable:$true] %s69_s13 }
  0x1a   :  { %s3632_s4 = scalar_lea.vmem %s56_s30, 512  ;;  %p3637_p11 = scmp.lt.s32.totalorder %s56_s30, %s56_s30 }
  0x1b   :  { %p3633_p10 = scmp.ne.s32.totalorder %s56_s30, %s3632_s4  ;;  %p3638_p12 = scmp.lt.s32.totalorder %s3632_s4, %s3632_s4 }
  0x1d   :  { %p3639_p13 = por %p3638_p12, %p3637_p11 }
  0x1f   :  { %p3640_p0 = pnand %p3639_p13, %p3633_p10 }
  0x21   :  { %3643 = shalt.err (!%p3640_p0)
}
  0x22   :  { %61 = dma.hbm_to_vmem [thread:$0]  %s4338_s5, 512, %s56_s30, [#allocation6], %s3694_s22, %s3694_s22, %s3695_s23  }
  0x23   :  { %s3652_s2 = scalar_lea.vmem %s70_s13, 512  ;;  %p3657_p2 = scmp.lt.s32.totalorder %s70_s13, %s70_s13 }
  0x24   :  { %p3653_p1 = scmp.ne.s32.totalorder %s70_s13, %s3652_s2  ;;  %p3658_p3 = scmp.lt.s32.totalorder %s3652_s2, %s3652_s2 }
  0x26   :  { %p3659_p4 = por %p3658_p3, %p3657_p2 }
  0x28   :  { %p3660_p5 = pnand %p3659_p4, %p3653_p1 }
  0x2a   :  { %3663 = shalt.err (!%p3660_p5)
}
  0x2b   :  { %75 = dma.hbm_to_vmem [thread:$0]  %s4340_s7, 512, %s70_s13, [#allocation9], %s3694_s22, %s3694_s22, %s3695_s23  }
  0x2c   :  { %3684 = dma.done.wait [#allocation3], 512  }
  0x2d   :  { %3685 = vsyncadd [#allocation3], 4294966784 }
  0x2e   :  { %3686 = dma.done.wait [#allocation6], 1024  }
  0x2f   :  { %3687 = vsyncadd [#allocation6], 4294966272 }
  0x30   :  { %3688 = dma.done.wait [#allocation9], 512  }
  0x31   :  { %3689 = vsyncadd [#allocation9], 4294966784  ;;  %v3698_v0 = vmov 0.0   ;;  %vm3699_vm0 = vmmov 0   ;;  %v99_v1 = vld [vmem:[%s4334_s1 + $0x18] sm:$0xff]  ;;  %v98_v3 = vld [vmem:[%s4334_s1 + $0x10] sm:$0xff] }
  0x32   :  { %3091 = vmatprep.subr.mxu1 %v3698_v0  ;;  %3099 = vmatprep.mubr.msk.f32.mxu1 %vm3699_vm0, %v3698_v0  ;;  %v3793_v2 = vld [vmem:[#allocation2 + $0x18] sm:$0xff]  ;;  %v3799_v4 = vld [vmem:[#allocation2 + $0x10] sm:$0xff]  ;;  %v97_v5 = vld [vmem:[%s4334_s1 + $0x8] sm:$0xff]  ;;  %vm111_vm1 = vcmask 261120   ;;  %s3700_s28 = smov 64   ;;  %vm323_vm2 = vcmask 1041409  }
  0x33   :  { %3080 = vmatprep.subr.mxu0 %v99_v1  ;;  %3092 = vmatpush3.msra.mxu1 %v3793_v2  ;;  %v3805_v6 = vld [vmem:[#allocation2 + $0x8] sm:$0xff]  ;;  %v96_v7 = vld [vmem:[%s4334_s1] sm:$0xff]  ;;  %vm2859_vm4 = vcmask 58368  }
  0x34   :  { %3081 = vmatpush3.msra.mxu0 %v99_v1  ;;  %3093 = vmatprep.subr.mxu1 %v3698_v0  ;;  %v3812_v8 = vld [vmem:[#allocation2] sm:$0xff]  ;;  %v95_v10 = vld [vmem:[%s4333_s0 + $0x8] sm:$0xff] }
  0x35   :  { %3082 = vmatprep.subr.mxu0 %v98_v3  ;;  %3094 = vmatpush3.msra.mxu1 %v3799_v4  ;;  %v94_v9 = vld [vmem:[%s4333_s0] sm:$0xff] }
  0x36   :  { %3083 = vmatpush3.msra.mxu0 %v98_v3  ;;  %3095 = vmatprep.subr.mxu1 %v3698_v0  ;;  %v2890_v11 = vld [vmem:[%s4336_s3] ss:$0 sm:$0xff]  ;;  %s3701_s3 = smov 32  }
  0x37   :  { %3084 = vmatprep.subr.mxu0 %v97_v5  ;;  %3096 = vmatpush3.msra.mxu1 %v3805_v6 }
  0x38   :  { %3085 = vmatpush3.msra.mxu0 %v97_v5  ;;  %3097 = vmatprep.subr.mxu1 %v3698_v0 }
  0x39   :  { %3086 = vmatprep.subr.mxu0 %v96_v7  ;;  %3098 = vmatpush3.msra.mxu1 %v3812_v8 }
  0x3a   :  { %3087 = vmatpush3.msra.mxu0 %v96_v7  ;;  %3088 = vmatprep.mubr.msk.f32.mxu0 %vm111_vm1, %v94_v9 }
  0x3b   :  { %3100 = vmatmul.mubr.f32.vlgmr.msra.gmra.mxu1 %v3698_v0  ;;  %3089 = vmatmul.mubr.msk.f32.vlgmr.msra.gmra.mxu0 %vm111_vm1, %v95_v10 }
  0x3c   :  { %3102 = vmatprep.subr.mxu0 %v3698_v0  ;;  %3110 = vmatprep.mubr.msk.f32.mxu0 %vm3699_vm0, %v3698_v0 }
  0x3d   :  { %3103 = vmatpush3.msra.mxu0 %v3793_v2  ;;  %3113 = vmatprep.subr.mxu1 %v3698_v0 }
  0x3e   :  { %3104 = vmatprep.subr.mxu0 %v3698_v0  ;;  %3114 = vmatpush3.msra.mxu1 %v3793_v2 }
  0x3f   :  { %3105 = vmatpush3.msra.mxu0 %v3799_v4  ;;  %3115 = vmatprep.subr.mxu1 %v3698_v0 }
  0x40   :  { %3106 = vmatprep.subr.mxu0 %v3698_v0  ;;  %3116 = vmatpush3.msra.mxu1 %v3799_v4 }
  0x41   :  { %3107 = vmatpush3.msra.mxu0 %v3805_v6  ;;  %3117 = vmatprep.subr.mxu1 %v3698_v0 }
  0x42   :  { %3108 = vmatprep.subr.mxu0 %v3698_v0  ;;  %3118 = vmatpush3.msra.mxu1 %v3805_v6 }
  0x43   :  { %3109 = vmatpush3.msra.mxu0 %v3812_v8  ;;  %3119 = vmatprep.subr.mxu1 %v3698_v0 }
  0x44   :  { %3120 = vmatpush3.msra.mxu1 %v3812_v8  ;;  %3121 = vmatprep.mubr.msk.f32.mxu1 %vm3699_vm0, %v3698_v0 }
  0x45   :  { %3124 = vmatprep.subr.mxu0 %v3698_v0  ;;  %3135 = vmatprep.subr.mxu1 %v3698_v0 }
  0xfb   :  { %v262_v12 = vpop.f32.mrf.mxu1  ;;  %v3090_v13 = vpop.f32.mrf.mxu0 }
  0xfc   :  { %v267_v14 = vrot.slane %v262_v12, 1  ;;  %v3851_v15 = vadd.f32 %v3090_v13, %v2890_v11 }
  0xfd   :  { %v3101_v16 = vpop.f32.mrf.mxu1  ;;  %v184_v17 = vpop.f32.mrf.mxu0 }
  0xfe   :  { %v3853_v18 = vadd.f32 %v2890_v11, %v184_v17  ;;  %v271_v19 = vadd.f32 %v267_v14, %v3851_v15 }
 0x100   :  { %v270_v20 = vadd.f32 %v262_v12, %v3853_v18  ;;  %3388 = vtanh.f32 %v271_v19  ;;  %v2894_v23 = vmul.f32 -1.442695, %v271_v19 }
 0x102   :  { %3390 = vtanh.f32 %v270_v20  ;;  %v2893_v24 = vmul.f32 -1.442695, %v270_v20 }
 0x103   :  { %3392 = vpow2.f32 %v2894_v23 }
 0x104   :  { %3394 = vpow2.f32 %v2893_v24 }
 0x10d   :  { %v3389_v21 = vpop.eup %3388 }
 0x10e   :  { %292 = vrot.lane.b32.xlu0 %v3389_v21, %s3700_s28 }
 0x10f   :  { %v3391_v22 = vpop.eup %3390 }
 0x110   :  { %v3393_v25 = vpop.eup %3392 }
 0x111   :  { %v279_v26 = vadd.f32 1.0, %v3393_v25  ;;  %v3395_v27 = vpop.eup %3394 }
 0x112   :  { %290 = vrot.lane.b32.xlu0 %v3391_v22, %s3700_s28  ;;  %v278_v28 = vadd.f32 1.0, %v3395_v27 }
 0x113   :  { %3396 = vrcp.f32 %v279_v26 }
 0x114   :  { %3398 = vrcp.f32 %v278_v28 }
 0x120   :  { %v3397_v29 = vpop.eup %3396 }
 0x121   :  { %v3399_v32 = vpop.eup %3398  ;;  %v287_v35 = vmul.f32 0.0, %v3397_v29 }
 0x122   :  { %v286_v38 = vmul.f32 0.0, %v3399_v32 }
 0x180   :  { %v293_v30 = vpop.permute.xlu0 %292 }
 0x181   :  { %v297_v31 = vmul.f32 %v3397_v29, %v293_v30 }
 0x183   :  { %302 = vrot.lane.b32.xlu1 %v297_v31, %s3701_s3 }
 0x184   :  { %v291_v33 = vpop.permute.xlu0 %290 }
 0x185   :  { %v296_v34 = vmul.f32 %v3399_v32, %v291_v33 }
 0x187   :  { %300 = vrot.lane.b32.xlu1 %v296_v34, %s3701_s3 }
 0x1f5   :  { %v303_v36 = vpop.permute.xlu1 %302 }
 0x1f6   :  { %v307_v37 = vadd.f32 %v303_v36, %v287_v35 }
 0x1f8   :  { %3400 = vtanh.f32 %v307_v37  ;;  %v422_v10 = vrot.slane %v307_v37, 7 }
 0x1f9   :  { %v301_v39 = vpop.permute.xlu1 %300 }
 0x1fa   :  { %v306_v40 = vadd.f32 %v301_v39, %v286_v38 }
 0x1fc   :  { %3402 = vtanh.f32 %v306_v40  ;;  %v421_v12 = vrot.slane %v306_v40, 7 }
 0x205   :  { %v3401_v41 = vpop.eup %3400 }
 0x206   :  { %314 = vrot.lane.b32.xlu0 %v3401_v41, %s3700_s28 }
 0x209   :  { %v3403_v42 = vpop.eup %3402 }
 0x20a   :  { %312 = vrot.lane.b32.xlu1 %v3403_v42, %s3700_s28 }
 0x278   :  { %v315_v43 = vpop.permute.xlu0 %314 }
 0x279   :  { %v319_v44 = vmul.f32 %v3397_v29, %v315_v43 }
 0x27b   :  { %v322_v46 = vrot.slane %v319_v44, 7 }
 0x27c   :  { %v313_v45 = vpop.permute.xlu1 %312 }
 0x27d   :  { %v318_v47 = vmul.f32 %v3399_v32, %v313_v45 }
 0x27f   :  { %v324_v48 = vsel %vm323_vm2, %v322_v46, %v318_v47 }
 0x280   :  { %325 = vrot.lane.b32.xlu0 %v324_v48, %s3701_s3 }
 0x2f2   :  { %v3865_v49 = vpop.permute.xlu0 %325 }
 0x2f3   :  { %3111 = vmatmul.mubr.msk.f32.vlgmr.msra.gmra.mxu0 %vm111_vm1, %v3865_v49 }
 0x2f4   :  { %3125 = vmatpush3.msra.mxu0 %v3793_v2  ;;  %3132 = vmatprep.mubr.msk.f32.mxu0 %vm3699_vm0, %v3698_v0 }
 0x2f5   :  { %3126 = vmatprep.subr.mxu0 %v3698_v0 }
 0x2f6   :  { %3127 = vmatpush3.msra.mxu0 %v3799_v4 }
 0x2f7   :  { %3128 = vmatprep.subr.mxu0 %v3698_v0 }
 0x2f8   :  { %3129 = vmatpush3.msra.mxu0 %v3805_v6 }
 0x2f9   :  { %3130 = vmatprep.subr.mxu0 %v3698_v0 }
 0x2fa   :  { %3131 = vmatpush3.msra.mxu0 %v3812_v8 }
 0x2fb   :  { %3146 = vmatprep.subr.mxu0 %v3698_v0 }
 0x3b3   :  { %v395_v50 = vpop.f32.mrf.mxu0 }
 0x3b4   :  { %v400_v51 = vrot.slane %v395_v50, 7  ;;  %v404_v52 = vadd.f32 %v395_v50, %v3851_v15 }
 0x3b5   :  { %v3112_v53 = vpop.f32.mrf.mxu0 }
 0x3b6   :  { %v403_v54 = vadd.f32 %v400_v51, %v3853_v18  ;;  %3404 = vtanh.f32 %v404_v52  ;;  %v2897_v57 = vmul.f32 -1.442695, %v404_v52 }
 0x3b8   :  { %3406 = vtanh.f32 %v403_v54  ;;  %v2896_v58 = vmul.f32 -1.442695, %v403_v54 }
 0x3b9   :  { %3408 = vpow2.f32 %v2897_v57 }
 0x3ba   :  { %3410 = vpow2.f32 %v2896_v58 }
 0x3c3   :  { %v3405_v55 = vpop.eup %3404 }
 0x3c4   :  { %431 = vrot.lane.b32.xlu0 %v3405_v55, %s3700_s28 }
 0x3c5   :  { %v3407_v56 = vpop.eup %3406 }
 0x3c6   :  { %429 = vrot.lane.b32.xlu1 %v3407_v56, %s3700_s28  ;;  %v3409_v59 = vpop.eup %3408 }
 0x3c7   :  { %v3411_v60 = vpop.eup %3410  ;;  %v412_v61 = vadd.f32 1.0, %v3409_v59 }
 0x3c8   :  { %v411_v62 = vadd.f32 1.0, %v3411_v60 }
 0x3c9   :  { %3412 = vrcp.f32 %v412_v61 }
 0x3ca   :  { %3414 = vrcp.f32 %v411_v62 }
 0x3d6   :  { %v3413_v63 = vpop.eup %3412 }
 0x3d7   :  { %v3415_v5 = vpop.eup %3414  ;;  %v426_v11 = vmul.f32 %v3413_v63, %v422_v10 }
 0x3d8   :  { %v425_v16 = vmul.f32 %v3415_v5, %v421_v12 }
 0x436   :  { %v432_v1 = vpop.permute.xlu0 %431 }
 0x437   :  { %v436_v3 = vmul.f32 %v3413_v63, %v432_v1 }
 0x438   :  { %v430_v7 = vpop.permute.xlu1 %429 }
 0x439   :  { %441 = vrot.lane.b32.xlu0 %v436_v3, %s3701_s3  ;;  %v435_v9 = vmul.f32 %v3415_v5, %v430_v7 }
 0x43b   :  { %439 = vrot.lane.b32.xlu1 %v435_v9, %s3701_s3 }
 0x4ab   :  { %v442_v13 = vpop.permute.xlu0 %441 }
 0x4ac   :  { %v446_v14 = vadd.f32 %v442_v13, %v426_v11 }
 0x4ad   :  { %v440_v17 = vpop.permute.xlu1 %439 }
 0x4ae   :  { %3416 = vtanh.f32 %v446_v14  ;;  %v445_v19 = vadd.f32 %v440_v17, %v425_v16  ;;  %v561_v51 = vrot.slane %v446_v14, 7 }
 0x4b0   :  { %3418 = vtanh.f32 %v445_v19  ;;  %v560_v50 = vrot.slane %v445_v19, 7 }
 0x4bb   :  { %v3417_v20 = vpop.eup %3416 }
 0x4bc   :  { %453 = vrot.lane.b32.xlu0 %v3417_v20, %s3700_s28 }
 0x4bd   :  { %v3419_v21 = vpop.eup %3418 }
 0x4be   :  { %451 = vrot.lane.b32.xlu1 %v3419_v21, %s3700_s28 }
 0x52e   :  { %v454_v22 = vpop.permute.xlu0 %453 }
 0x52f   :  { %v458_v25 = vmul.f32 %v3413_v63, %v454_v22 }
 0x530   :  { %v452_v23 = vpop.permute.xlu1 %451 }
 0x531   :  { %v457_v24 = vmul.f32 %v3415_v5, %v452_v23 }
 0x533   :  { %v461_v26 = vrot.slane %v457_v24, 1 }
 0x535   :  { %v462_v27 = vsel %vm323_vm2, %v458_v25, %v461_v26 }
 0x536   :  { %463 = vrot.lane.b32.xlu1 %v462_v27, %s3701_s3 }
 0x5a8   :  { %v3889_v28 = vpop.permute.xlu1 %463 }
 0x5a9   :  { %3122 = vmatmul.mubr.msk.f32.vlgmr.msra.gmra.mxu1 %vm111_vm1, %v3889_v28 }
 0x5aa   :  { %3136 = vmatpush3.msra.mxu1 %v3793_v2  ;;  %3143 = vmatprep.mubr.msk.f32.mxu1 %vm3699_vm0, %v3698_v0 }
 0x5ab   :  { %3137 = vmatprep.subr.mxu1 %v3698_v0 }
 0x5ac   :  { %3138 = vmatpush3.msra.mxu1 %v3799_v4 }
 0x5ad   :  { %3139 = vmatprep.subr.mxu1 %v3698_v0 }
 0x5ae   :  { %3140 = vmatpush3.msra.mxu1 %v3805_v6 }
 0x5af   :  { %3141 = vmatprep.subr.mxu1 %v3698_v0 }
 0x5b0   :  { %3142 = vmatpush3.msra.mxu1 %v3812_v8 }
 0x5b1   :  { %3157 = vmatprep.subr.mxu1 %v3698_v0 }
 0x669   :  { %v533_v29 = vpop.f32.mrf.mxu1 }
 0x66a   :  { %v538_v30 = vrot.slane %v533_v29, 6  ;;  %v539_v31 = vrot.slane %v533_v29, 7 }
 0x66b   :  { %v3123_v32 = vpop.f32.mrf.mxu1 }
 0x66c   :  { %v542_v33 = vadd.f32 %v538_v30, %v3853_v18  ;;  %v543_v34 = vadd.f32 %v539_v31, %v3851_v15 }
 0x66e   :  { %3420 = vtanh.f32 %v542_v33  ;;  %v2899_v37 = vmul.f32 -1.442695, %v542_v33  ;;  %v2900_v38 = vmul.f32 -1.442695, %v543_v34 }
 0x66f   :  { %3422 = vtanh.f32 %v543_v34 }
 0x670   :  { %3424 = vpow2.f32 %v2899_v37 }
 0x671   :  { %3426 = vpow2.f32 %v2900_v38 }
 0x67b   :  { %v3421_v35 = vpop.eup %3420 }
 0x67c   :  { %v3423_v36 = vpop.eup %3422  ;;  %568 = vrot.lane.b32.xlu0 %v3421_v35, %s3700_s28 }
 0x67d   :  { %570 = vrot.lane.b32.xlu1 %v3423_v36, %s3700_s28  ;;  %v3425_v39 = vpop.eup %3424 }
 0x67e   :  { %v3427_v40 = vpop.eup %3426  ;;  %v550_v41 = vadd.f32 1.0, %v3425_v39 }
 0x67f   :  { %v551_v42 = vadd.f32 1.0, %v3427_v40 }
 0x680   :  { %3428 = vrcp.f32 %v550_v41 }
 0x681   :  { %3430 = vrcp.f32 %v551_v42 }
 0x68d   :  { %v3429_v43 = vpop.eup %3428 }
 0x68e   :  { %v3431_v45 = vpop.eup %3430  ;;  %v564_v52 = vmul.f32 %v3429_v43, %v560_v50 }
 0x68f   :  { %v565_v53 = vmul.f32 %v3431_v45, %v561_v51 }
 0x6ee   :  { %v569_v44 = vpop.permute.xlu0 %568 }
 0x6ef   :  { %v571_v46 = vpop.permute.xlu1 %570  ;;  %v574_v47 = vmul.f32 %v3429_v43, %v569_v44 }
 0x6f0   :  { %v575_v48 = vmul.f32 %v3431_v45, %v571_v46 }
 0x6f1   :  { %578 = vrot.lane.b32.xlu0 %v574_v47, %s3701_s3 }
 0x6f2   :  { %580 = vrot.lane.b32.xlu1 %v575_v48, %s3701_s3 }
 0x763   :  { %v579_v54 = vpop.permute.xlu0 %578 }
 0x764   :  { %v581_v55 = vpop.permute.xlu1 %580  ;;  %v584_v56 = vadd.f32 %v579_v54, %v564_v52 }
 0x765   :  { %v585_v57 = vadd.f32 %v581_v55, %v565_v53 }
 0x766   :  { %3432 = vtanh.f32 %v584_v56  ;;  %v700_v32 = vrot.slane %v584_v56, 7 }
 0x767   :  { %3434 = vtanh.f32 %v585_v57  ;;  %v701_v33 = vrot.slane %v585_v57, 7 }
 0x773   :  { %v3433_v58 = vpop.eup %3432 }
 0x774   :  { %v3435_v59 = vpop.eup %3434  ;;  %590 = vrot.lane.b32.xlu0 %v3433_v58, %s3700_s28 }
 0x775   :  { %592 = vrot.lane.b32.xlu1 %v3435_v59, %s3700_s28 }
 0x7e6   :  { %v591_v60 = vpop.permute.xlu0 %590 }
 0x7e7   :  { %v593_v61 = vpop.permute.xlu1 %592  ;;  %v596_v62 = vmul.f32 %v3429_v43, %v591_v60 }
 0x7e8   :  { %v597_v63 = vmul.f32 %v3431_v45, %v593_v61 }
 0x7e9   :  { %v600_v1 = vrot.slane %v596_v62, 2 }
 0x7ea   :  { %v601_v3 = vrot.slane %v597_v63, 1 }
 0x7ec   :  { %v602_v5 = vsel %vm323_vm2, %v601_v3, %v600_v1 }
 0x7ed   :  { %603 = vrot.lane.b32.xlu0 %v602_v5, %s3701_s3 }
 0x85f   :  { %v3913_v7 = vpop.permute.xlu0 %603 }
 0x860   :  { %3133 = vmatmul.mubr.msk.f32.vlgmr.msra.gmra.mxu0 %vm111_vm1, %v3913_v7 }
 0x861   :  { %3147 = vmatpush3.msra.mxu0 %v3793_v2  ;;  %3154 = vmatprep.mubr.msk.f32.mxu0 %vm3699_vm0, %v3698_v0 }
 0x862   :  { %3148 = vmatprep.subr.mxu0 %v3698_v0 }
 0x863   :  { %3149 = vmatpush3.msra.mxu0 %v3799_v4 }
 0x864   :  { %3150 = vmatprep.subr.mxu0 %v3698_v0 }
 0x865   :  { %3151 = vmatpush3.msra.mxu0 %v3805_v6 }
 0x866   :  { %3152 = vmatprep.subr.mxu0 %v3698_v0 }
 0x867   :  { %3153 = vmatpush3.msra.mxu0 %v3812_v8 }
 0x868   :  { %3168 = vmatprep.subr.mxu0 %v3698_v0 }
 0x920   :  { %v673_v9 = vpop.f32.mrf.mxu0 }
 0x921   :  { %v678_v10 = vrot.slane %v673_v9, 5  ;;  %v679_v11 = vrot.slane %v673_v9, 6 }
 0x922   :  { %v3134_v12 = vpop.f32.mrf.mxu0 }
 0x923   :  { %v682_v13 = vadd.f32 %v678_v10, %v3853_v18  ;;  %v683_v14 = vadd.f32 %v679_v11, %v3851_v15 }
 0x925   :  { %3436 = vtanh.f32 %v682_v13  ;;  %v2902_v19 = vmul.f32 -1.442695, %v682_v13  ;;  %v2903_v20 = vmul.f32 -1.442695, %v683_v14 }
 0x926   :  { %3438 = vtanh.f32 %v683_v14 }
 0x927   :  { %3440 = vpow2.f32 %v2902_v19 }
 0x928   :  { %3442 = vpow2.f32 %v2903_v20 }
 0x932   :  { %v3437_v16 = vpop.eup %3436 }
 0x933   :  { %v3439_v17 = vpop.eup %3438  ;;  %708 = vrot.lane.b32.xlu1 %v3437_v16, %s3700_s28 }
 0x934   :  { %710 = vrot.lane.b32.xlu0 %v3439_v17, %s3700_s28  ;;  %v3441_v21 = vpop.eup %3440 }
 0x935   :  { %v3443_v22 = vpop.eup %3442  ;;  %v690_v23 = vadd.f32 1.0, %v3441_v21 }
 0x936   :  { %v691_v24 = vadd.f32 1.0, %v3443_v22 }
 0x937   :  { %3444 = vrcp.f32 %v690_v23 }
 0x938   :  { %3446 = vrcp.f32 %v691_v24 }
 0x944   :  { %v3445_v25 = vpop.eup %3444 }
 0x945   :  { %v3447_v27 = vpop.eup %3446  ;;  %v704_v34 = vmul.f32 %v3445_v25, %v700_v32 }
 0x946   :  { %v705_v35 = vmul.f32 %v3447_v27, %v701_v33 }
 0x9a5   :  { %v709_v26 = vpop.permute.xlu1 %708 }
 0x9a6   :  { %v711_v29 = vpop.permute.xlu0 %710  ;;  %v714_v30 = vmul.f32 %v3445_v25, %v709_v26 }
 0x9a7   :  { %v715_v31 = vmul.f32 %v3447_v27, %v711_v29 }
 0x9a8   :  { %718 = vrot.lane.b32.xlu1 %v714_v30, %s3701_s3 }
 0x9a9   :  { %720 = vrot.lane.b32.xlu0 %v715_v31, %s3701_s3 }
 0xa1a   :  { %v719_v36 = vpop.permute.xlu1 %718 }
 0xa1b   :  { %v721_v37 = vpop.permute.xlu0 %720  ;;  %v724_v38 = vadd.f32 %v719_v36, %v704_v34 }
 0xa1c   :  { %v725_v39 = vadd.f32 %v721_v37, %v705_v35 }
 0xa1d   :  { %3448 = vtanh.f32 %v724_v38  ;;  %v840_v13 = vrot.slane %v724_v38, 7 }
 0xa1e   :  { %3450 = vtanh.f32 %v725_v39  ;;  %v841_v14 = vrot.slane %v725_v39, 7 }
 0xa2a   :  { %v3449_v40 = vpop.eup %3448 }
 0xa2b   :  { %v3451_v41 = vpop.eup %3450  ;;  %730 = vrot.lane.b32.xlu1 %v3449_v40, %s3700_s28 }
 0xa2c   :  { %732 = vrot.lane.b32.xlu0 %v3451_v41, %s3700_s28 }
 0xa9d   :  { %v731_v42 = vpop.permute.xlu1 %730 }
 0xa9e   :  { %v733_v43 = vpop.permute.xlu0 %732  ;;  %v736_v44 = vmul.f32 %v3445_v25, %v731_v42 }
 0xa9f   :  { %v737_v45 = vmul.f32 %v3447_v27, %v733_v43 }
 0xaa0   :  { %v740_v46 = vrot.slane %v736_v44, 3 }
 0xaa1   :  { %v741_v47 = vrot.slane %v737_v45, 2 }
 0xaa3   :  { %v742_v48 = vsel %vm323_vm2, %v741_v47, %v740_v46 }
 0xaa4   :  { %743 = vrot.lane.b32.xlu1 %v742_v48, %s3701_s3 }
 0xb16   :  { %v3937_v50 = vpop.permute.xlu1 %743 }
 0xb17   :  { %3144 = vmatmul.mubr.msk.f32.vlgmr.msra.gmra.mxu1 %vm111_vm1, %v3937_v50 }
 0xb18   :  { %3158 = vmatpush3.msra.mxu1 %v3793_v2  ;;  %3165 = vmatprep.mubr.msk.f32.mxu1 %vm3699_vm0, %v3698_v0 }
 0xb19   :  { %3159 = vmatprep.subr.mxu1 %v3698_v0 }
 0xb1a   :  { %3160 = vmatpush3.msra.mxu1 %v3799_v4 }
 0xb1b   :  { %3161 = vmatprep.subr.mxu1 %v3698_v0 }
 0xb1c   :  { %3162 = vmatpush3.msra.mxu1 %v3805_v6 }
 0xb1d   :  { %3163 = vmatprep.subr.mxu1 %v3698_v0 }
 0xb1e   :  { %3164 = vmatpush3.msra.mxu1 %v3812_v8 }
 0xb1f   :  { %3179 = vmatprep.subr.mxu1 %v3698_v0 }
 0xbd7   :  { %v813_v51 = vpop.f32.mrf.mxu1 }
 0xbd8   :  { %v818_v52 = vrot.slane %v813_v51, 4  ;;  %v819_v53 = vrot.slane %v813_v51, 5 }
 0xbd9   :  { %v3145_v54 = vpop.f32.mrf.mxu1 }
 0xbda   :  { %v822_v55 = vadd.f32 %v818_v52, %v3853_v18  ;;  %v823_v56 = vadd.f32 %v819_v53, %v3851_v15 }
 0xbdc   :  { %3452 = vtanh.f32 %v822_v55  ;;  %v2905_v59 = vmul.f32 -1.442695, %v822_v55  ;;  %v2906_v60 = vmul.f32 -1.442695, %v823_v56 }
 0xbdd   :  { %3454 = vtanh.f32 %v823_v56 }
 0xbde   :  { %3456 = vpow2.f32 %v2905_v59 }
 0xbdf   :  { %3458 = vpow2.f32 %v2906_v60 }
 0xbe9   :  { %v3453_v57 = vpop.eup %3452 }
 0xbea   :  { %v3455_v58 = vpop.eup %3454  ;;  %848 = vrot.lane.b32.xlu0 %v3453_v57, %s3700_s28 }
 0xbeb   :  { %850 = vrot.lane.b32.xlu1 %v3455_v58, %s3700_s28  ;;  %v3457_v61 = vpop.eup %3456 }
 0xbec   :  { %v3459_v62 = vpop.eup %3458  ;;  %v830_v63 = vadd.f32 1.0, %v3457_v61 }
 0xbed   :  { %v831_v1 = vadd.f32 1.0, %v3459_v62 }
 0xbee   :  { %3460 = vrcp.f32 %v830_v63 }
 0xbef   :  { %3462 = vrcp.f32 %v831_v1 }
 0xbfb   :  { %v3461_v3 = vpop.eup %3460 }
 0xbfc   :  { %v3463_v9 = vpop.eup %3462  ;;  %v844_v16 = vmul.f32 %v3461_v3, %v840_v13  ;;  %v3997_v13 = vld [vmem:[#allocation5 + $0x10] sm:$0xff] }
 0xbfd   :  { %v845_v17 = vmul.f32 %v3463_v9, %v841_v14  ;;  %v4003_v14 = vld [vmem:[#allocation5 + $0x8] sm:$0xff] }
 0xc5c   :  { %v849_v5 = vpop.permute.xlu0 %848 }
 0xc5d   :  { %v851_v10 = vpop.permute.xlu1 %850  ;;  %v854_v11 = vmul.f32 %v3461_v3, %v849_v5 }
 0xc5e   :  { %v855_v12 = vmul.f32 %v3463_v9, %v851_v10 }
 0xc5f   :  { %858 = vrot.lane.b32.xlu0 %v854_v11, %s3701_s3  ;;  %v3991_v11 = vld [vmem:[#allocation5 + $0x18] sm:$0xff] }
 0xc60   :  { %860 = vrot.lane.b32.xlu1 %v855_v12, %s3701_s3 }
 0xcd1   :  { %v859_v19 = vpop.permute.xlu0 %858 }
 0xcd2   :  { %v861_v20 = vpop.permute.xlu1 %860  ;;  %v864_v21 = vadd.f32 %v859_v19, %v844_v16  ;;  %v4007_v16 = vld [vmem:[#allocation5] sm:$0xff] }
 0xcd3   :  { %v865_v22 = vadd.f32 %v861_v20, %v845_v17 }
 0xcd4   :  { %3464 = vtanh.f32 %v864_v21  ;;  %v980_v52 = vrot.slane %v864_v21, 7 }
 0xcd5   :  { %3466 = vtanh.f32 %v865_v22  ;;  %v981_v53 = vrot.slane %v865_v22, 7 }
 0xce1   :  { %v3465_v23 = vpop.eup %3464 }
 0xce2   :  { %v3467_v24 = vpop.eup %3466  ;;  %870 = vrot.lane.b32.xlu0 %v3465_v23, %s3700_s28 }
 0xce3   :  { %872 = vrot.lane.b32.xlu1 %v3467_v24, %s3700_s28 }
 0xd54   :  { %v871_v25 = vpop.permute.xlu0 %870 }
 0xd55   :  { %v873_v26 = vpop.permute.xlu1 %872  ;;  %v876_v27 = vmul.f32 %v3461_v3, %v871_v25 }
 0xd56   :  { %v877_v29 = vmul.f32 %v3463_v9, %v873_v26 }
 0xd57   :  { %v880_v30 = vrot.slane %v876_v27, 4 }
 0xd58   :  { %v881_v31 = vrot.slane %v877_v29, 3 }
 0xd5a   :  { %v882_v32 = vsel %vm323_vm2, %v881_v31, %v880_v30 }
 0xd5b   :  { %883 = vrot.lane.b32.xlu0 %v882_v32, %s3701_s3 }
 0xdcd   :  { %v3961_v33 = vpop.permute.xlu0 %883 }
 0xdce   :  { %3155 = vmatmul.mubr.msk.f32.vlgmr.msra.gmra.mxu0 %vm111_vm1, %v3961_v33 }
 0xdcf   :  { %3169 = vmatpush3.msra.mxu0 %v3793_v2  ;;  %3176 = vmatprep.mubr.msk.f32.mxu0 %vm3699_vm0, %v3698_v0 }
 0xdd0   :  { %3170 = vmatprep.subr.mxu0 %v3698_v0 }
 0xdd1   :  { %3171 = vmatpush3.msra.mxu0 %v3799_v4 }
 0xdd2   :  { %3172 = vmatprep.subr.mxu0 %v3698_v0 }
 0xdd3   :  { %3173 = vmatpush3.msra.mxu0 %v3805_v6 }
 0xdd4   :  { %3174 = vmatprep.subr.mxu0 %v3698_v0 }
 0xdd5   :  { %3175 = vmatpush3.msra.mxu0 %v3812_v8 }
 0xdd6   :  { %3190 = vmatprep.subr.mxu0 %v3698_v0 }
 0xe8e   :  { %v953_v34 = vpop.f32.mrf.mxu0 }
 0xe8f   :  { %v958_v35 = vrot.slane %v953_v34, 3  ;;  %v959_v2 = vrot.slane %v953_v34, 4 }
 0xe90   :  { %v3156_v36 = vpop.f32.mrf.mxu0 }
 0xe91   :  { %v962_v37 = vadd.f32 %v958_v35, %v3853_v18  ;;  %v963_v38 = vadd.f32 %v959_v2, %v3851_v15 }
 0xe93   :  { %3468 = vtanh.f32 %v962_v37  ;;  %v2908_v6 = vmul.f32 -1.442695, %v962_v37  ;;  %v2909_v8 = vmul.f32 -1.442695, %v963_v38 }
 0xe94   :  { %3470 = vtanh.f32 %v963_v38 }
 0xe95   :  { %3472 = vpow2.f32 %v2908_v6 }
 0xe96   :  { %3474 = vpow2.f32 %v2909_v8 }
 0xea0   :  { %v3469_v4 = vpop.eup %3468 }
 0xea1   :  { %v3471_v39 = vpop.eup %3470  ;;  %988 = vrot.lane.b32.xlu1 %v3469_v4, %s3700_s28 }
 0xea2   :  { %990 = vrot.lane.b32.xlu0 %v3471_v39, %s3700_s28  ;;  %v3473_v40 = vpop.eup %3472 }
 0xea3   :  { %v3475_v41 = vpop.eup %3474  ;;  %v970_v42 = vadd.f32 1.0, %v3473_v40 }
 0xea4   :  { %v971_v43 = vadd.f32 1.0, %v3475_v41 }
 0xea5   :  { %3476 = vrcp.f32 %v970_v42 }
 0xea6   :  { %3478 = vrcp.f32 %v971_v43 }
 0xeb2   :  { %v3477_v44 = vpop.eup %3476 }
 0xeb3   :  { %v3479_v46 = vpop.eup %3478  ;;  %v984_v54 = vmul.f32 %v3477_v44, %v980_v52 }
 0xeb4   :  { %v985_v55 = vmul.f32 %v3479_v46, %v981_v53 }
 0xf13   :  { %v989_v45 = vpop.permute.xlu1 %988 }
 0xf14   :  { %v991_v47 = vpop.permute.xlu0 %990  ;;  %v994_v48 = vmul.f32 %v3477_v44, %v989_v45 }
 0xf15   :  { %v995_v51 = vmul.f32 %v3479_v46, %v991_v47 }
 0xf16   :  { %998 = vrot.lane.b32.xlu1 %v994_v48, %s3701_s3 }
 0xf17   :  { %1000 = vrot.lane.b32.xlu0 %v995_v51, %s3701_s3 }
 0xf88   :  { %v999_v56 = vpop.permute.xlu1 %998 }
 0xf89   :  { %v1001_v57 = vpop.permute.xlu0 %1000  ;;  %v3981_v58 = vadd.f32 %v999_v56, %v984_v54 }
 0xf8a   :  { %v3983_v59 = vadd.f32 %v1001_v57, %v985_v55 }
 0xf8b   :  { %3480 = vtanh.f32 %v3981_v58  ;;  %v1120_v8 = vrot.slane %v3981_v58, 7  ;;  %v4073_v58 = vld [vmem:[#allocation7 + $0x18] sm:$0xff] }
 0xf8c   :  { %3482 = vtanh.f32 %v3983_v59  ;;  %v1121_v40 = vrot.slane %v3983_v59, 7 }
 0xf98   :  { %v3481_v60 = vpop.eup %3480 }
 0xf99   :  { %v3483_v61 = vpop.eup %3482  ;;  %1010 = vrot.lane.b32.xlu1 %v3481_v60, %s3700_s28  ;;  %v4077_v60 = vld [vmem:[#allocation7 + $0x10] sm:$0xff] }
 0xf9a   :  { %1012 = vrot.lane.b32.xlu0 %v3483_v61, %s3700_s28  ;;  %v4083_v61 = vld [vmem:[#allocation7 + $0x8] sm:$0xff] }
0x100b   :  { %v1011_v62 = vpop.permute.xlu1 %1010 }
0x100c   :  { %v1013_v63 = vpop.permute.xlu0 %1012  ;;  %v1016_v1 = vmul.f32 %v3477_v44, %v1011_v62  ;;  %v4091_v62 = vld [vmem:[#allocation7] sm:$0xff] }
0x100d   :  { %v1017_v3 = vmul.f32 %v3479_v46, %v1013_v63 }
0x100e   :  { %v1020_v5 = vrot.slane %v1016_v1, 5 }
0x100f   :  { %v1021_v9 = vrot.slane %v1017_v3, 4 }
0x1011   :  { %v1022_v10 = vsel %vm323_vm2, %v1021_v9, %v1020_v5 }
0x1012   :  { %1023 = vrot.lane.b32.xlu1 %v1022_v10, %s3701_s3 }
0x1084   :  { %v3993_v12 = vpop.permute.xlu1 %1023 }
0x1085   :  { %3166 = vmatmul.mubr.msk.f32.vlgmr.msra.gmra.mxu1 %vm111_vm1, %v3993_v12 }
0x1086   :  { %3180 = vmatpush3.msra.mxu1 %v3991_v11  ;;  %3187 = vmatprep.mubr.msk.f32.mxu1 %vm3699_vm0, %v3698_v0 }
0x1087   :  { %3181 = vmatprep.subr.mxu1 %v3698_v0 }
0x1088   :  { %3182 = vmatpush3.msra.mxu1 %v3997_v13 }
0x1089   :  { %3183 = vmatprep.subr.mxu1 %v3698_v0 }
0x108a   :  { %3184 = vmatpush3.msra.mxu1 %v4003_v14 }
0x108b   :  { %3185 = vmatprep.subr.mxu1 %v3698_v0 }
0x108c   :  { %3186 = vmatpush3.msra.mxu1 %v4007_v16 }
0x108d   :  { %3188 = vmatmul.mubr.msk.f32.vlgmr.msra.gmra.mxu1 %vm111_vm1, %v3865_v49  ;;  %3201 = vmatprep.subr.mxu1 %v3698_v0 }
0x108e   :  { %3202 = vmatpush3.msra.mxu1 %v3991_v11  ;;  %3209 = vmatprep.mubr.msk.f32.mxu1 %vm3699_vm0, %v3698_v0 }
0x108f   :  { %3203 = vmatprep.subr.mxu1 %v3698_v0 }
0x1090   :  { %3204 = vmatpush3.msra.mxu1 %v3997_v13 }
0x1091   :  { %3205 = vmatprep.subr.mxu1 %v3698_v0 }
0x1092   :  { %3206 = vmatpush3.msra.mxu1 %v4003_v14 }
0x1093   :  { %3207 = vmatprep.subr.mxu1 %v3698_v0 }
0x1094   :  { %3208 = vmatpush3.msra.mxu1 %v4007_v16 }
0x1095   :  { %3210 = vmatmul.mubr.msk.f32.vlgmr.msra.gmra.mxu1 %vm111_vm1, %v3913_v7  ;;  %3223 = vmatprep.subr.mxu1 %v3698_v0 }
0x1096   :  { %3224 = vmatpush3.msra.mxu1 %v3991_v11  ;;  %3231 = vmatprep.mubr.msk.f32.mxu1 %vm3699_vm0, %v3698_v0 }
0x1097   :  { %3225 = vmatprep.subr.mxu1 %v3698_v0 }
0x1098   :  { %3226 = vmatpush3.msra.mxu1 %v3997_v13 }
0x1099   :  { %3227 = vmatprep.subr.mxu1 %v3698_v0 }
0x109a   :  { %3228 = vmatpush3.msra.mxu1 %v4003_v14 }
0x109b   :  { %3229 = vmatprep.subr.mxu1 %v3698_v0 }
0x109c   :  { %3230 = vmatpush3.msra.mxu1 %v4007_v16 }
0x109d   :  { %3232 = vmatmul.mubr.msk.f32.vlgmr.msra.gmra.mxu1 %vm111_vm1, %v3961_v33  ;;  %3245 = vmatprep.subr.mxu1 %v3698_v0 }
0x109e   :  { %3246 = vmatpush3.msra.mxu1 %v3991_v11  ;;  %3253 = vmatprep.mubr.msk.f32.mxu1 %vm3699_vm0, %v3698_v0 }
0x109f   :  { %3247 = vmatprep.subr.mxu1 %v3698_v0 }
0x10a0   :  { %3248 = vmatpush3.msra.mxu1 %v3997_v13 }
0x10a1   :  { %3249 = vmatprep.subr.mxu1 %v3698_v0 }
0x10a2   :  { %3250 = vmatpush3.msra.mxu1 %v4003_v14 }
0x10a3   :  { %3251 = vmatprep.subr.mxu1 %v3698_v0 }
0x10a4   :  { %3252 = vmatpush3.msra.mxu1 %v4007_v16 }
0x10a5   :  { %3267 = vmatprep.subr.mxu1 %v3698_v0 }
0x1145   :  { %v1093_v49 = vpop.f32.mrf.mxu1 }
0x1146   :  { %v1098_v7 = vrot.slane %v1093_v49, 2  ;;  %v1099_v17 = vrot.slane %v1093_v49, 3 }
0x1147   :  { %v3167_v19 = vpop.f32.mrf.mxu1 }
0x1148   :  { %v1102_v20 = vadd.f32 %v1098_v7, %v3853_v18  ;;  %v1103_v21 = vadd.f32 %v1099_v17, %v3851_v15 }
0x114a   :  { %3484 = vtanh.f32 %v1102_v20  ;;  %v2911_v31 = vmul.f32 -1.442695, %v1102_v20  ;;  %v2912_v32 = vmul.f32 -1.442695, %v1103_v21 }
0x114b   :  { %3486 = vtanh.f32 %v1103_v21 }
0x114c   :  { %3488 = vpow2.f32 %v2911_v31 }
0x114d   :  { %v4051_v22 = vpop.f32.mrf.mxu1  ;;  %3490 = vpow2.f32 %v2912_v32 }
0x114f   :  { %v3189_v23 = vpop.f32.mrf.mxu1 }
0x1155   :  { %v4053_v24 = vpop.f32.mrf.mxu1 }
0x1157   :  { %v3485_v25 = vpop.eup %3484  ;;  %v3211_v26 = vpop.f32.mrf.mxu1 }
0x1158   :  { %v3487_v27 = vpop.eup %3486  ;;  %1128 = vrot.lane.b32.xlu0 %v3485_v25, %s3700_s28 }
0x1159   :  { %1130 = vrot.lane.b32.xlu1 %v3487_v27, %s3700_s28  ;;  %v3489_v33 = vpop.eup %3488 }
0x115a   :  { %v3491_v34 = vpop.eup %3490  ;;  %v1110_v35 = vadd.f32 1.0, %v3489_v33 }
0x115b   :  { %v1111_v2 = vadd.f32 1.0, %v3491_v34 }
0x115c   :  { %3492 = vrcp.f32 %v1110_v35 }
0x115d   :  { %v4057_v29 = vpop.f32.mrf.mxu1  ;;  %3494 = vrcp.f32 %v1111_v2 }
0x115f   :  { %v3233_v30 = vpop.f32.mrf.mxu1 }
0x1169   :  { %v3493_v36 = vpop.eup %3492 }
0x116a   :  { %v3495_v38 = vpop.eup %3494  ;;  %v1124_v41 = vmul.f32 %v3493_v36, %v1120_v8 }
0x116b   :  { %v1125_v42 = vmul.f32 %v3495_v38, %v1121_v40 }
0x11ca   :  { %v1129_v37 = vpop.permute.xlu0 %1128 }
0x11cb   :  { %v1131_v4 = vpop.permute.xlu1 %1130  ;;  %v1134_v39 = vmul.f32 %v3493_v36, %v1129_v37 }
0x11cc   :  { %v1135_v6 = vmul.f32 %v3495_v38, %v1131_v4 }
0x11cd   :  { %1138 = vrot.lane.b32.xlu0 %v1134_v39, %s3701_s3 }
0x11ce   :  { %1140 = vrot.lane.b32.xlu1 %v1135_v6, %s3701_s3 }
0x123f   :  { %v1139_v43 = vpop.permute.xlu0 %1138 }
0x1240   :  { %v1141_v44 = vpop.permute.xlu1 %1140  ;;  %v4063_v45 = vadd.f32 %v1139_v43, %v1124_v41 }
0x1241   :  { %v4065_v46 = vadd.f32 %v1141_v44, %v1125_v42 }
0x1242   :  { %3496 = vtanh.f32 %v4063_v45  ;;  %v1260_v40 = vrot.slane %v4063_v45, 7 }
0x1243   :  { %3498 = vtanh.f32 %v4065_v46  ;;  %v1261_v41 = vrot.slane %v4065_v46, 7 }
0x124f   :  { %v3497_v47 = vpop.eup %3496 }
0x1250   :  { %v3499_v48 = vpop.eup %3498  ;;  %1150 = vrot.lane.b32.xlu0 %v3497_v47, %s3700_s28 }
0x1251   :  { %1152 = vrot.lane.b32.xlu1 %v3499_v48, %s3700_s28 }
0x12c2   :  { %v1151_v51 = vpop.permute.xlu0 %1150 }
0x12c3   :  { %v1153_v52 = vpop.permute.xlu1 %1152  ;;  %v1156_v53 = vmul.f32 %v3493_v36, %v1151_v51 }
0x12c4   :  { %v1157_v54 = vmul.f32 %v3495_v38, %v1153_v52 }
0x12c5   :  { %v1160_v55 = vrot.slane %v1156_v53, 6 }
0x12c6   :  { %v1161_v56 = vrot.slane %v1157_v54, 5 }
0x12c8   :  { %v1162_v57 = vsel %vm323_vm2, %v1161_v56, %v1160_v55 }
0x12c9   :  { %1163 = vrot.lane.b32.xlu0 %v1162_v57, %s3701_s3 }
0x133b   :  { %v1164_v59 = vpop.permute.xlu0 %1163 }
0x133c   :  { %3177 = vmatmul.mubr.msk.f32.vlgmr.msra.gmra.mxu0 %vm111_vm1, %v1164_v59  ;;  %3254 = vmatmul.mubr.msk.f32.vlgmr.msra.gmra.mxu1 %vm111_vm1, %v1164_v59 }
0x133d   :  { %3191 = vmatpush3.msra.mxu0 %v3991_v11  ;;  %3268 = vmatpush3.msra.mxu1 %v4073_v58 }
0x133e   :  { %3192 = vmatprep.subr.mxu0 %v3698_v0  ;;  %3269 = vmatprep.subr.mxu1 %v3698_v0 }
0x133f   :  { %3193 = vmatpush3.msra.mxu0 %v3997_v13  ;;  %3270 = vmatpush3.msra.mxu1 %v4077_v60 }
0x1340   :  { %3194 = vmatprep.subr.mxu0 %v3698_v0  ;;  %3271 = vmatprep.subr.mxu1 %v3698_v0 }
0x1341   :  { %3195 = vmatpush3.msra.mxu0 %v4003_v14  ;;  %3272 = vmatpush3.msra.mxu1 %v4083_v61 }
0x1342   :  { %3196 = vmatprep.subr.mxu0 %v3698_v0  ;;  %3273 = vmatprep.subr.mxu1 %v3698_v0 }
0x1343   :  { %3197 = vmatpush3.msra.mxu0 %v4007_v16  ;;  %3198 = vmatprep.mubr.msk.f32.mxu0 %vm3699_vm0, %v3698_v0 }
0x1344   :  { %3274 = vmatpush3.msra.mxu1 %v4091_v62  ;;  %3275 = vmatprep.mubr.msk.f32.mxu1 %vm3699_vm0, %v3698_v0 }
0x1345   :  { %3199 = vmatmul.mubr.msk.f32.vlgmr.msra.gmra.mxu0 %vm111_vm1, %v3889_v28  ;;  %3212 = vmatprep.subr.mxu0 %v3698_v0 }
0x1346   :  { %3276 = vmatmul.mubr.f32.vlgmr.msra.gmra.mxu1 %v3698_v0  ;;  %3213 = vmatpush3.msra.mxu0 %v3991_v11 }
0x1347   :  { %3214 = vmatprep.subr.mxu0 %v3698_v0  ;;  %3220 = vmatprep.mubr.msk.f32.mxu0 %vm3699_vm0, %v3698_v0 }
0x1348   :  { %3215 = vmatpush3.msra.mxu0 %v3997_v13  ;;  %3289 = vmatprep.subr.mxu1 %v3698_v0 }
0x1349   :  { %3216 = vmatprep.subr.mxu0 %v3698_v0  ;;  %3290 = vmatpush3.msra.mxu1 %v4073_v58 }
0x134a   :  { %3217 = vmatpush3.msra.mxu0 %v4003_v14  ;;  %3291 = vmatprep.subr.mxu1 %v3698_v0 }
0x134b   :  { %3218 = vmatprep.subr.mxu0 %v3698_v0  ;;  %3292 = vmatpush3.msra.mxu1 %v4077_v60 }
0x134c   :  { %3219 = vmatpush3.msra.mxu0 %v4007_v16  ;;  %3293 = vmatprep.subr.mxu1 %v3698_v0 }
0x134d   :  { %3221 = vmatmul.mubr.msk.f32.vlgmr.msra.gmra.mxu0 %vm111_vm1, %v3937_v50  ;;  %3234 = vmatprep.subr.mxu0 %v3698_v0 }
0x134e   :  { %3235 = vmatpush3.msra.mxu0 %v3991_v11  ;;  %3242 = vmatprep.mubr.msk.f32.mxu0 %vm3699_vm0, %v3698_v0 }
0x134f   :  { %3236 = vmatprep.subr.mxu0 %v3698_v0  ;;  %3294 = vmatpush3.msra.mxu1 %v4083_v61 }
0x1350   :  { %3237 = vmatpush3.msra.mxu0 %v3997_v13  ;;  %3295 = vmatprep.subr.mxu1 %v3698_v0 }
0x1351   :  { %3238 = vmatprep.subr.mxu0 %v3698_v0  ;;  %3296 = vmatpush3.msra.mxu1 %v4091_v62 }
0x1352   :  { %3239 = vmatpush3.msra.mxu0 %v4003_v14  ;;  %3297 = vmatprep.mubr.msk.f32.mxu1 %vm3699_vm0, %v3698_v0 }
0x1353   :  { %3240 = vmatprep.subr.mxu0 %v3698_v0  ;;  %3311 = vmatprep.subr.mxu1 %v3698_v0 }
0x1354   :  { %3241 = vmatpush3.msra.mxu0 %v4007_v16 }
0x1355   :  { %3243 = vmatmul.mubr.msk.f32.vlgmr.msra.gmra.mxu0 %vm111_vm1, %v3993_v12  ;;  %3256 = vmatprep.subr.mxu0 %v3698_v0 }
0x1356   :  { %3257 = vmatpush3.msra.mxu0 %v3991_v11  ;;  %3264 = vmatprep.mubr.msk.f32.mxu0 %vm3699_vm0, %v3698_v0  ;;  %v4157_v11 = vld [vmem:[%s4339_s6] ss:$0 sm:$0xff] }
0x1357   :  { %3258 = vmatprep.subr.mxu0 %v3698_v0  ;;  %v1380_v12 = vadd.f32 %v4157_v11, %v4051_v22 }
0x1358   :  { %3259 = vmatpush3.msra.mxu0 %v3997_v13 }
0x1359   :  { %3260 = vmatprep.subr.mxu0 %v3698_v0 }
0x135a   :  { %3261 = vmatpush3.msra.mxu0 %v4003_v14 }
0x135b   :  { %3262 = vmatprep.subr.mxu0 %v3698_v0 }
0x135c   :  { %3263 = vmatpush3.msra.mxu0 %v4007_v16 }
0x135d   :  { %3278 = vmatprep.subr.mxu0 %v3698_v0 }
0x13fc   :  { %v1233_v28 = vpop.f32.mrf.mxu0  ;;  %v4150_v50 = vpop.f32.mrf.mxu1 }
0x13fd   :  { %v1238_v63 = vrot.slane %v1233_v28, 1  ;;  %v1239_v1 = vrot.slane %v1233_v28, 2 }
0x13fe   :  { %v3178_v3 = vpop.f32.mrf.mxu0  ;;  %v3255_v5 = vpop.f32.mrf.mxu1 }
0x13ff   :  { %v1242_v9 = vadd.f32 %v1238_v63, %v3853_v18  ;;  %v1243_v10 = vadd.f32 %v1239_v1, %v3851_v15 }
0x1401   :  { %3500 = vtanh.f32 %v1242_v9  ;;  %v2914_v23 = vmul.f32 -1.442695, %v1242_v9  ;;  %v2915_v25 = vmul.f32 -1.442695, %v1243_v10 }
0x1402   :  { %3502 = vtanh.f32 %v1243_v10 }
0x1405   :  { %v4161_v13 = vpop.f32.mrf.mxu0 }
0x1406   :  { %v1948_v14 = vpop.f32.mrf.mxu1 }
0x1407   :  { %v1952_v16 = vadd.f32 %v1948_v14, %v1380_v12  ;;  %v3200_v49 = vpop.f32.mrf.mxu0 }
0x1408   :  { %v3277_v7 = vpop.f32.mrf.mxu1  ;;  %v1450_v49 = vadd.f32 %v4157_v11, %v4161_v13 }
0x1409   :  { %3504 = vtanh.f32 %v1952_v16  ;;  %v2925_v26 = vmul.f32 -1.442695, %v1952_v16 }
0x140a   :  { %3506 = vpow2.f32 %v2914_v23 }
0x140b   :  { %3508 = vpow2.f32 %v2915_v25 }
0x140c   :  { %3510 = vpow2.f32 %v2925_v26 }
0x140d   :  { %v4163_v18 = vpop.f32.mrf.mxu0 }
0x140e   :  { %v3501_v15 = vpop.eup %3500 }
0x140f   :  { %v3503_v17 = vpop.eup %3502  ;;  %v3222_v19 = vpop.f32.mrf.mxu0  ;;  %1268 = vrot.lane.b32.xlu1 %v3501_v15, %s3700_s28 }
0x1410   :  { %1270 = vrot.lane.b32.xlu0 %v3503_v17, %s3700_s28 }
0x1415   :  { %v4167_v20 = vpop.f32.mrf.mxu0 }
0x1416   :  { %v3505_v21 = vpop.eup %3504 }
0x1417   :  { %1962 = vrot.lane.b32.xlu1 %v3505_v21, %s3700_s28  ;;  %v3244_v22 = vpop.f32.mrf.mxu0  ;;  %v3507_v27 = vpop.eup %3506 }
0x1418   :  { %v3509_v30 = vpop.eup %3508  ;;  %v1250_v31 = vadd.f32 1.0, %v3507_v27 }
0x1419   :  { %v1251_v32 = vadd.f32 1.0, %v3509_v30  ;;  %v3511_v33 = vpop.eup %3510 }
0x141a   :  { %3512 = vrcp.f32 %v1250_v31  ;;  %v1956_v34 = vadd.f32 1.0, %v3511_v33 }
0x141b   :  { %3514 = vrcp.f32 %v1251_v32 }
0x141c   :  { %3516 = vrcp.f32 %v1956_v34 }
0x1427   :  { %v3513_v35 = vpop.eup %3512 }
0x1428   :  { %v3515_v36 = vpop.eup %3514  ;;  %v1264_v42 = vmul.f32 %v3513_v35, %v1260_v40 }
0x1429   :  { %v3517_v39 = vpop.eup %3516  ;;  %v1265_v43 = vmul.f32 %v3515_v36, %v1261_v41 }
0x142a   :  { %v1960_v52 = vmul.f32 0.0, %v3517_v39 }
0x1481   :  { %v1269_v2 = vpop.permute.xlu1 %1268 }
0x1482   :  { %v1271_v37 = vpop.permute.xlu0 %1270  ;;  %v1274_v38 = vmul.f32 %v3513_v35, %v1269_v2  ;;  %v1520_v2 = vadd.f32 %v4157_v11, %v4053_v24 }
0x1483   :  { %v1275_v4 = vmul.f32 %v3515_v36, %v1271_v37 }
0x1484   :  { %1278 = vrot.lane.b32.xlu0 %v1274_v38, %s3701_s3 }
0x1485   :  { %1280 = vrot.lane.b32.xlu1 %v1275_v4, %s3701_s3 }
0x1489   :  { %v1963_v6 = vpop.permute.xlu1 %1962 }
0x148a   :  { %v1965_v8 = vmul.f32 %v3517_v39, %v1963_v6 }
0x148c   :  { %1967 = vrot.lane.b32.xlu0 %v1965_v8, %s3701_s3 }
0x14f6   :  { %v1279_v44 = vpop.permute.xlu0 %1278 }
0x14f7   :  { %v1281_v47 = vpop.permute.xlu1 %1280  ;;  %v1284_v48 = vadd.f32 %v1279_v44, %v1264_v42 }
0x14f8   :  { %v1285_v51 = vadd.f32 %v1281_v47, %v1265_v43 }
0x14f9   :  { %3518 = vtanh.f32 %v1284_v48 }
0x14fa   :  { %3520 = vtanh.f32 %v1285_v51 }
0x14fe   :  { %v1968_v53 = vpop.permute.xlu0 %1967 }
0x14ff   :  { %v1970_v54 = vadd.f32 %v1968_v53, %v1960_v52 }
0x1501   :  { %3522 = vtanh.f32 %v1970_v54 }
0x1506   :  { %v3519_v55 = vpop.eup %3518 }
0x1507   :  { %v3521_v56 = vpop.eup %3520  ;;  %1290 = vrot.lane.b32.xlu1 %v3519_v55, %s3700_s28  ;;  %v1590_v55 = vadd.f32 %v4157_v11, %v4163_v18 }
0x1508   :  { %1292 = vrot.lane.b32.xlu0 %v3521_v56, %s3700_s28 }
0x150e   :  { %v3523_v45 = vpop.eup %3522 }
0x150f   :  { %1973 = vrot.lane.b32.xlu1 %v3523_v45, %s3700_s28 }
0x1579   :  { %v1291_v46 = vpop.permute.xlu1 %1290 }
0x157a   :  { %v1293_v57 = vpop.permute.xlu0 %1292  ;;  %v1296_v59 = vmul.f32 %v3513_v35, %v1291_v46 }
0x157b   :  { %v1297_v28 = vmul.f32 %v3515_v36, %v1293_v57 }
0x157c   :  { %v1805_v63 = vrot.slane %v1296_v59, 7 }
0x157d   :  { %v1806_v1 = vrot.slane %v1297_v28, 6 }
0x157f   :  { %v1807_v3 = vsel %vm323_vm2, %v1806_v1, %v1805_v63 }
0x1580   :  { %1808 = vrot.lane.b32.xlu0 %v1807_v3, %s3701_s3 }
0x1581   :  { %v1974_v5 = vpop.permute.xlu1 %1973 }
0x1582   :  { %v4180_v9 = vmul.f32 %v3517_v39, %v1974_v5 }
0x1584   :  { %1979 = vrot.lane.b32.xlu1 %v4180_v9, %s3701_s3 }
0x15f2   :  { %v1809_v10 = vpop.permute.xlu0 %1808 }
0x15f3   :  { %3265 = vmatmul.mubr.msk.f32.vlgmr.msra.gmra.mxu0 %vm111_vm1, %v1809_v10 }
0x15f4   :  { %3279 = vmatpush3.msra.mxu0 %v4073_v58  ;;  %3286 = vmatprep.mubr.msk.f32.mxu0 %vm3699_vm0, %v3698_v0 }
0x15f5   :  { %3280 = vmatprep.subr.mxu0 %v3698_v0 }
0x15f6   :  { %3281 = vmatpush3.msra.mxu0 %v4077_v60  ;;  %v1980_v12 = vpop.permute.xlu1 %1979 }
0x15f7   :  { %3282 = vmatprep.subr.mxu0 %v3698_v0 }
0x15f8   :  { %3283 = vmatpush3.msra.mxu0 %v4083_v61 }
0x15f9   :  { %3284 = vmatprep.subr.mxu0 %v3698_v0 }
0x15fa   :  { %3285 = vmatpush3.msra.mxu0 %v4091_v62 }
0x15fb   :  { %3287 = vmatmul.mubr.msk.f32.vlgmr.msra.gmra.mxu0 %vm111_vm1, %v1980_v12  ;;  %3300 = vmatprep.subr.mxu0 %v3698_v0 }
0x15fc   :  { %3301 = vmatpush3.msra.mxu0 %v4073_v58  ;;  %3308 = vmatprep.mubr.msk.f32.mxu0 %vm3699_vm0, %v3698_v0 }
0x15fd   :  { %3302 = vmatprep.subr.mxu0 %v3698_v0 }
0x15fe   :  { %3303 = vmatpush3.msra.mxu0 %v4077_v60 }
0x15ff   :  { %3304 = vmatprep.subr.mxu0 %v3698_v0 }
0x1600   :  { %3305 = vmatpush3.msra.mxu0 %v4083_v61 }
0x1601   :  { %3306 = vmatprep.subr.mxu0 %v3698_v0 }
0x1602   :  { %3307 = vmatpush3.msra.mxu0 %v4091_v62 }
0x1603   :  { %3322 = vmatprep.subr.mxu0 %v3698_v0 }
0x16b3   :  { %v4206_v14 = vpop.f32.mrf.mxu0 }
0x16b5   :  { %v3266_v16 = vpop.f32.mrf.mxu0 }
0x16bb   :  { %v2049_v7 = vpop.f32.mrf.mxu0 }
0x16bc   :  { %v2053_v15 = vadd.f32 %v2049_v7, %v1450_v49 }
0x16bd   :  { %v3288_v17 = vpop.f32.mrf.mxu0 }
0x16be   :  { %3524 = vtanh.f32 %v2053_v15  ;;  %v2927_v21 = vmul.f32 -1.442695, %v2053_v15  ;;  %v1660_v17 = vadd.f32 %v4157_v11, %v4057_v29 }
0x16c0   :  { %3526 = vpow2.f32 %v2927_v21 }
0x16cb   :  { %v3525_v19 = vpop.eup %3524 }
0x16cc   :  { %2063 = vrot.lane.b32.xlu0 %v3525_v19, %s3700_s28 }
0x16cd   :  { %v3527_v22 = vpop.eup %3526 }
0x16ce   :  { %v2057_v23 = vadd.f32 1.0, %v3527_v22 }
0x16d0   :  { %3528 = vrcp.f32 %v2057_v23 }
0x16dd   :  { %v3529_v25 = vpop.eup %3528 }
0x16de   :  { %v2061_v30 = vmul.f32 %v3529_v25, %v1970_v54 }
0x173e   :  { %v2064_v26 = vpop.permute.xlu0 %2063 }
0x173f   :  { %v2066_v27 = vmul.f32 %v3529_v25, %v2064_v26 }
0x1741   :  { %2068 = vrot.lane.b32.xlu1 %v2066_v27, %s3701_s3 }
0x17b3   :  { %v2069_v31 = vpop.permute.xlu1 %2068 }
0x17b4   :  { %v2071_v13 = vadd.f32 %v2069_v31, %v2061_v30 }
0x17b6   :  { %3530 = vtanh.f32 %v2071_v13 }
0x17c3   :  { %v3531_v32 = vpop.eup %3530 }
0x17c4   :  { %2074 = vrot.lane.b32.xlu0 %v3531_v32, %s3700_s28 }
0x1836   :  { %v2075_v33 = vpop.permute.xlu0 %2074 }
0x1837   :  { %v2077_v34 = vmul.f32 %v3529_v25, %v2075_v33 }
0x1839   :  { %2080 = vrot.lane.b32.xlu1 %v2077_v34, %s3701_s3  ;;  %v2078_v51 = vadd.f32 %v2077_v34, %v4180_v9 }
0x18ab   :  { %v2081_v35 = vpop.permute.xlu1 %2080 }
0x18ac   :  { %3298 = vmatmul.mubr.msk.f32.vlgmr.msra.gmra.mxu1 %vm111_vm1, %v2081_v35 }
0x18ad   :  { %3312 = vmatpush3.msra.mxu1 %v4073_v58  ;;  %3319 = vmatprep.mubr.msk.f32.mxu1 %vm3699_vm0, %v3698_v0 }
0x18ae   :  { %3313 = vmatprep.subr.mxu1 %v3698_v0 }
0x18af   :  { %3314 = vmatpush3.msra.mxu1 %v4077_v60 }
0x18b0   :  { %3315 = vmatprep.subr.mxu1 %v3698_v0 }
0x18b1   :  { %3316 = vmatpush3.msra.mxu1 %v4083_v61 }
0x18b2   :  { %3317 = vmatprep.subr.mxu1 %v3698_v0 }
0x18b3   :  { %3318 = vmatpush3.msra.mxu1 %v4091_v62 }
0x18b4   :  { %3333 = vmatprep.subr.mxu1 %v3698_v0 }
0x196c   :  { %v2150_v36 = vpop.f32.mrf.mxu1 }
0x196d   :  { %v2154_v37 = vadd.f32 %v2150_v36, %v1520_v2 }
0x196e   :  { %v3299_v38 = vpop.f32.mrf.mxu1 }
0x196f   :  { %3532 = vtanh.f32 %v2154_v37  ;;  %v2929_v39 = vmul.f32 -1.442695, %v2154_v37 }
0x1971   :  { %3534 = vpow2.f32 %v2929_v39 }
0x197c   :  { %v3533_v4 = vpop.eup %3532 }
0x197d   :  { %2164 = vrot.lane.b32.xlu0 %v3533_v4, %s3700_s28 }
0x197e   :  { %v3535_v6 = vpop.eup %3534 }
0x197f   :  { %v2158_v8 = vadd.f32 1.0, %v3535_v6 }
0x1981   :  { %3536 = vrcp.f32 %v2158_v8 }
0x198e   :  { %v3537_v40 = vpop.eup %3536 }
0x198f   :  { %v2162_v43 = vmul.f32 %v3537_v40, %v2071_v13 }
0x19ef   :  { %v2165_v41 = vpop.permute.xlu0 %2164 }
0x19f0   :  { %v2167_v42 = vmul.f32 %v3537_v40, %v2165_v41 }
0x19f2   :  { %2169 = vrot.lane.b32.xlu1 %v2167_v42, %s3701_s3 }
0x1a64   :  { %v2170_v44 = vpop.permute.xlu1 %2169 }
0x1a65   :  { %v2172_v24 = vadd.f32 %v2170_v44, %v2162_v43 }
0x1a67   :  { %3538 = vtanh.f32 %v2172_v24 }
0x1a74   :  { %v3539_v47 = vpop.eup %3538 }
0x1a75   :  { %2175 = vrot.lane.b32.xlu0 %v3539_v47, %s3700_s28 }
0x1ae7   :  { %v2176_v48 = vpop.permute.xlu0 %2175 }
0x1ae8   :  { %v2178_v52 = vmul.f32 %v3537_v40, %v2176_v48 }
0x1aea   :  { %v2179_v53 = vadd.f32 %v2178_v52, %v2078_v51  ;;  %2181 = vrot.lane.b32.xlu1 %v2178_v52, %s3701_s3  ;;  %v1800_v52 = vadd.f32 %v4157_v11, %v4150_v50 }
0x1b5c   :  { %v2182_v54 = vpop.permute.xlu1 %2181 }
0x1b5d   :  { %3309 = vmatmul.mubr.msk.f32.vlgmr.msra.gmra.mxu0 %vm111_vm1, %v2182_v54 }
0x1b5e   :  { %3323 = vmatpush3.msra.mxu0 %v4073_v58  ;;  %3330 = vmatprep.mubr.msk.f32.mxu0 %vm3699_vm0, %v3698_v0 }
0x1b5f   :  { %3324 = vmatprep.subr.mxu0 %v3698_v0 }
0x1b60   :  { %3325 = vmatpush3.msra.mxu0 %v4077_v60 }
0x1b61   :  { %3326 = vmatprep.subr.mxu0 %v3698_v0 }
0x1b62   :  { %3327 = vmatpush3.msra.mxu0 %v4083_v61 }
0x1b63   :  { %3328 = vmatprep.subr.mxu0 %v3698_v0 }
0x1b64   :  { %3329 = vmatpush3.msra.mxu0 %v4091_v62 }
0x1b65   :  { %3344 = vmatprep.subr.mxu0 %v3698_v0 }
0x1c1d   :  { %v2251_v56 = vpop.f32.mrf.mxu0 }
0x1c1e   :  { %v2255_v45 = vadd.f32 %v2251_v56, %v1590_v55 }
0x1c1f   :  { %v3310_v46 = vpop.f32.mrf.mxu0 }
0x1c20   :  { %3540 = vtanh.f32 %v2255_v45  ;;  %v2931_v59 = vmul.f32 -1.442695, %v2255_v45 }
0x1c22   :  { %3542 = vpow2.f32 %v2931_v59 }
0x1c2d   :  { %v3541_v57 = vpop.eup %3540 }
0x1c2e   :  { %2265 = vrot.lane.b32.xlu0 %v3541_v57, %s3700_s28 }
0x1c2f   :  { %v3543_v28 = vpop.eup %3542 }
0x1c30   :  { %v2259_v63 = vadd.f32 1.0, %v3543_v28 }
0x1c32   :  { %3544 = vrcp.f32 %v2259_v63 }
0x1c3f   :  { %v3545_v1 = vpop.eup %3544 }
0x1c40   :  { %v2263_v9 = vmul.f32 %v3545_v1, %v2172_v24 }
0x1ca0   :  { %v2266_v3 = vpop.permute.xlu0 %2265 }
0x1ca1   :  { %v2268_v5 = vmul.f32 %v3545_v1, %v2266_v3 }
0x1ca3   :  { %2270 = vrot.lane.b32.xlu1 %v2268_v5, %s3701_s3 }
0x1d15   :  { %v2271_v10 = vpop.permute.xlu1 %2270 }
0x1d16   :  { %v2273_v18 = vadd.f32 %v2271_v10, %v2263_v9 }
0x1d18   :  { %3546 = vtanh.f32 %v2273_v18 }
0x1d25   :  { %v3547_v12 = vpop.eup %3546 }
0x1d26   :  { %2276 = vrot.lane.b32.xlu0 %v3547_v12, %s3700_s28 }
0x1d98   :  { %v2277_v16 = vpop.permute.xlu0 %2276 }
0x1d99   :  { %v2279_v49 = vmul.f32 %v3545_v1, %v2277_v16  ;;  %v1879_v16 = vadd.f32 %v4157_v11, %v4206_v14  ;;  %v2689_v14 = vld [vmem:[#allocation8 + $0x18] sm:$0xff] }
0x1d9b   :  { %v2280_v7 = vadd.f32 %v2279_v49, %v2179_v53  ;;  %2282 = vrot.lane.b32.xlu1 %v2279_v49, %s3701_s3 }
0x1e0d   :  { %v2283_v15 = vpop.permute.xlu1 %2282 }
0x1e0e   :  { %3320 = vmatmul.mubr.msk.f32.vlgmr.msra.gmra.mxu1 %vm111_vm1, %v2283_v15 }
0x1e0f   :  { %3334 = vmatpush3.msra.mxu1 %v4073_v58  ;;  %3341 = vmatprep.mubr.msk.f32.mxu1 %vm3699_vm0, %v3698_v0 }
0x1e10   :  { %3335 = vmatprep.subr.mxu1 %v3698_v0 }
0x1e11   :  { %3336 = vmatpush3.msra.mxu1 %v4077_v60 }
0x1e12   :  { %3337 = vmatprep.subr.mxu1 %v3698_v0 }
0x1e13   :  { %3338 = vmatpush3.msra.mxu1 %v4083_v61 }
0x1e14   :  { %3339 = vmatprep.subr.mxu1 %v3698_v0 }
0x1e15   :  { %3340 = vmatpush3.msra.mxu1 %v4091_v62 }
0x1e16   :  { %3355 = vmatprep.subr.mxu1 %v3698_v0 }
0x1ece   :  { %v2352_v19 = vpop.f32.mrf.mxu1 }
0x1ecf   :  { %v2356_v21 = vadd.f32 %v2352_v19, %v1660_v17 }
0x1ed0   :  { %v3321_v22 = vpop.f32.mrf.mxu1 }
0x1ed1   :  { %3548 = vtanh.f32 %v2356_v21  ;;  %v2933_v25 = vmul.f32 -1.442695, %v2356_v21 }
0x1ed3   :  { %3550 = vpow2.f32 %v2933_v25 }
0x1ede   :  { %v3549_v23 = vpop.eup %3548 }
0x1edf   :  { %2366 = vrot.lane.b32.xlu0 %v3549_v23, %s3700_s28 }
0x1ee0   :  { %v3551_v26 = vpop.eup %3550 }
0x1ee1   :  { %v2360_v27 = vadd.f32 1.0, %v3551_v26 }
0x1ee3   :  { %3552 = vrcp.f32 %v2360_v27 }
0x1ef0   :  { %v3553_v30 = vpop.eup %3552 }
0x1ef1   :  { %v2364_v32 = vmul.f32 %v3553_v30, %v2273_v18 }
0x1f51   :  { %v2367_v31 = vpop.permute.xlu0 %2366 }
0x1f52   :  { %v2369_v13 = vmul.f32 %v3553_v30, %v2367_v31  ;;  %v2688_v31 = vld [vmem:[#allocation8 + $0x10] sm:$0xff] }
0x1f54   :  { %2371 = vrot.lane.b32.xlu1 %v2369_v13, %s3701_s3  ;;  %v2687_v13 = vld [vmem:[#allocation8 + $0x8] sm:$0xff] }
0x1fc6   :  { %v2372_v33 = vpop.permute.xlu1 %2371 }
0x1fc7   :  { %v2374_v29 = vadd.f32 %v2372_v33, %v2364_v32  ;;  %v2686_v32 = vld [vmem:[#allocation8] sm:$0xff] }
0x1fc9   :  { %3554 = vtanh.f32 %v2374_v29 }
0x1fd6   :  { %v3555_v34 = vpop.eup %3554 }
0x1fd7   :  { %2377 = vrot.lane.b32.xlu0 %v3555_v34, %s3700_s28 }
0x2049   :  { %v2378_v35 = vpop.permute.xlu0 %2377 }
0x204a   :  { %v2380_v2 = vmul.f32 %v3553_v30, %v2378_v35 }
0x204c   :  { %v2381_v36 = vadd.f32 %v2380_v2, %v2280_v7  ;;  %2383 = vrot.lane.b32.xlu1 %v2380_v2, %s3701_s3 }
0x20be   :  { %v2384_v37 = vpop.permute.xlu1 %2383 }
0x20bf   :  { %3331 = vmatmul.mubr.msk.f32.vlgmr.msra.gmra.mxu0 %vm111_vm1, %v2384_v37 }
0x20c0   :  { %3345 = vmatpush3.msra.mxu0 %v4073_v58  ;;  %3352 = vmatprep.mubr.msk.f32.mxu0 %vm3699_vm0, %v3698_v0  ;;  %v1730_v58 = vadd.f32 %v4157_v11, %v4167_v20 }
0x20c1   :  { %3346 = vmatprep.subr.mxu0 %v3698_v0 }
0x20c2   :  { %3347 = vmatpush3.msra.mxu0 %v4077_v60 }
0x20c3   :  { %3348 = vmatprep.subr.mxu0 %v3698_v0 }
0x20c4   :  { %3349 = vmatpush3.msra.mxu0 %v4083_v61 }
0x20c5   :  { %3350 = vmatprep.subr.mxu0 %v3698_v0 }
0x20c6   :  { %3351 = vmatpush3.msra.mxu0 %v4091_v62 }
0x20c7   :  { %3366 = vmatprep.subr.mxu0 %v3698_v0 }
0x217f   :  { %v2453_v38 = vpop.f32.mrf.mxu0 }
0x2180   :  { %v2457_v4 = vadd.f32 %v2453_v38, %v1730_v58  ;;  %v2777_v58 = vld [vmem:[%s4342_s9 + $0x10] sm:$0xff]  ;;  %v2776_v38 = vld [vmem:[%s4342_s9 + $0x8] sm:$0xff] }
0x2181   :  { %v3332_v39 = vpop.f32.mrf.mxu0 }
0x2182   :  { %3556 = vtanh.f32 %v2457_v4  ;;  %v2935_v60 = vmul.f32 -1.442695, %v2457_v4  ;;  %v2775_v4 = vld [vmem:[%s4342_s9] sm:$0xff] }
0x2183   :  { %v2940_v39 = vld [vmem:[%s4341_s8] ss:$0 sm:$0xff]  ;;  %s3702_s8 = smov [#allocation10]  }
0x2184   :  { %3558 = vpow2.f32 %v2935_v60 }
0x218f   :  { %v3557_v6 = vpop.eup %3556 }
0x2190   :  { %2467 = vrot.lane.b32.xlu0 %v3557_v6, %s3700_s28 }
0x2191   :  { %v3559_v8 = vpop.eup %3558 }
0x2192   :  { %v2461_v61 = vadd.f32 1.0, %v3559_v8 }
0x2194   :  { %3560 = vrcp.f32 %v2461_v61 }
0x21a1   :  { %v3561_v40 = vpop.eup %3560 }
0x21a2   :  { %v2465_v42 = vmul.f32 %v3561_v40, %v2374_v29  ;;  %v2778_v29 = vld [vmem:[%s4342_s9 + $0x18] sm:$0xff]  ;;  %s2879_s9 = sshll.u32 %s3702_s8, 4  ;;  %s2880_s9 = int_to_ptr.vmem [resolvable:$true] %s2879_s9 }
0x21a3   :  { %p3669_p7 = scmp.lt.s32.totalorder %s2880_s9, %s2880_s9 }
0x2202   :  { %v2468_v41 = vpop.permute.xlu0 %2467 }
0x2203   :  { %v2470_v62 = vmul.f32 %v3561_v40, %v2468_v41 }
0x2205   :  { %2472 = vrot.lane.b32.xlu1 %v2470_v62, %s3701_s3 }
0x2277   :  { %v2473_v43 = vpop.permute.xlu1 %2472 }
0x2278   :  { %v2475_v20 = vadd.f32 %v2473_v43, %v2465_v42 }
0x227a   :  { %3562 = vtanh.f32 %v2475_v20 }
0x2287   :  { %v3563_v44 = vpop.eup %3562 }
0x2288   :  { %2478 = vrot.lane.b32.xlu0 %v3563_v44, %s3700_s28 }
0x22fa   :  { %v2479_v24 = vpop.permute.xlu0 %2478 }
0x22fb   :  { %v2481_v47 = vmul.f32 %v3561_v40, %v2479_v24 }
0x22fd   :  { %v2482_v48 = vadd.f32 %v2481_v47, %v2381_v36  ;;  %2484 = vrot.lane.b32.xlu1 %v2481_v47, %s3701_s3 }
0x236f   :  { %v2485_v51 = vpop.permute.xlu1 %2484 }
0x2370   :  { %3342 = vmatmul.mubr.msk.f32.vlgmr.msra.gmra.mxu1 %vm111_vm1, %v2485_v51 }
0x2371   :  { %3363 = vmatprep.mubr.msk.f32.mxu1 %vm3699_vm0, %v3698_v0  ;;  %3356 = vmatpush3.msra.mxu1 %v2689_v14 }
0x2372   :  { %3357 = vmatprep.subr.mxu1 %v3698_v0 }
0x2373   :  { %3358 = vmatpush3.msra.mxu1 %v2688_v31 }
0x2374   :  { %3359 = vmatprep.subr.mxu1 %v3698_v0 }
0x2375   :  { %3360 = vmatpush3.msra.mxu1 %v2687_v13 }
0x2376   :  { %3361 = vmatprep.subr.mxu1 %v3698_v0 }
0x2377   :  { %3362 = vmatpush3.msra.mxu1 %v2686_v32 }
0x2430   :  { %v2554_v53 = vpop.f32.mrf.mxu1 }
0x2431   :  { %v2558_v54 = vadd.f32 %v2554_v53, %v1800_v52 }
0x2432   :  { %v3343_v55 = vpop.f32.mrf.mxu1 }
0x2433   :  { %3564 = vtanh.f32 %v2558_v54  ;;  %v2937_v45 = vmul.f32 -1.442695, %v2558_v54 }
0x2435   :  { %3566 = vpow2.f32 %v2937_v45 }
0x2440   :  { %v3565_v56 = vpop.eup %3564 }
0x2441   :  { %2568 = vrot.lane.b32.xlu0 %v3565_v56, %s3700_s28 }
0x2442   :  { %v3567_v46 = vpop.eup %3566 }
0x2443   :  { %v2562_v57 = vadd.f32 1.0, %v3567_v46 }
0x2445   :  { %3568 = vrcp.f32 %v2562_v57 }
0x2452   :  { %v3569_v59 = vpop.eup %3568 }
0x2453   :  { %v2566_v1 = vmul.f32 %v3569_v59, %v2475_v20 }
0x24b3   :  { %v2569_v28 = vpop.permute.xlu0 %2568 }
0x24b4   :  { %v2571_v63 = vmul.f32 %v3569_v59, %v2569_v28 }
0x24b6   :  { %2573 = vrot.lane.b32.xlu1 %v2571_v63, %s3701_s3 }
0x2528   :  { %v2574_v3 = vpop.permute.xlu1 %2573 }
0x2529   :  { %v2576_v50 = vadd.f32 %v2574_v3, %v2566_v1 }
0x252b   :  { %3570 = vtanh.f32 %v2576_v50 }
0x2538   :  { %v3571_v5 = vpop.eup %3570 }
0x2539   :  { %2579 = vrot.lane.b32.xlu0 %v3571_v5, %s3700_s28 }
0x25ab   :  { %v2580_v9 = vpop.permute.xlu0 %2579 }
0x25ac   :  { %v2582_v10 = vmul.f32 %v3569_v59, %v2580_v9 }
0x25ae   :  { %v2583_v18 = vadd.f32 %v2582_v10, %v2482_v48  ;;  %2585 = vrot.lane.b32.xlu1 %v2582_v10, %s3701_s3 }
0x2620   :  { %v2586_v12 = vpop.permute.xlu1 %2585 }
0x2621   :  { %3353 = vmatmul.mubr.msk.f32.vlgmr.msra.gmra.mxu0 %vm111_vm1, %v2586_v12 }
0x2622   :  { %3374 = vmatprep.mubr.msk.f32.mxu0 %vm3699_vm0, %v3698_v0  ;;  %3367 = vmatpush3.msra.mxu0 %v2778_v29 }
0x2623   :  { %3368 = vmatprep.subr.mxu0 %v3698_v0 }
0x2624   :  { %3369 = vmatpush3.msra.mxu0 %v2777_v58 }
0x2625   :  { %3370 = vmatprep.subr.mxu0 %v3698_v0 }
0x2626   :  { %3371 = vmatpush3.msra.mxu0 %v2776_v38 }
0x2627   :  { %3372 = vmatprep.subr.mxu0 %v3698_v0  ;;  %v2942_v0 = vld [vmem:[%s4343_s10] ss:$0 sm:$0xff]  ;;  %s3664_s10 = scalar_lea.vmem %s2880_s9, 32 }
0x2628   :  { %3373 = vmatpush3.msra.mxu0 %v2775_v4  ;;  %p3665_p6 = scmp.ne.s32.totalorder %s2880_s9, %s3664_s10  ;;  %p3670_p8 = scmp.lt.s32.totalorder %s3664_s10, %s3664_s10 }
0x262a   :  { %p3671_p9 = por %p3670_p8, %p3669_p7 }
0x262c   :  { %p3672_p10 = pnand %p3671_p9, %p3665_p6 }
0x26e1   :  { %v2655_v49 = vpop.f32.mrf.mxu0 }
0x26e2   :  { %v2659_v7 = vadd.f32 %v2655_v49, %v1879_v16 }
0x26e3   :  { %v3354_v15 = vpop.f32.mrf.mxu0 }
0x26e4   :  { %3572 = vtanh.f32 %v2659_v7  ;;  %v2939_v19 = vmul.f32 -1.442695, %v2659_v7 }
0x26e6   :  { %3574 = vpow2.f32 %v2939_v19 }
0x26f1   :  { %v3573_v17 = vpop.eup %3572 }
0x26f2   :  { %2669 = vrot.lane.b32.xlu0 %v3573_v17, %s3700_s28 }
0x26f3   :  { %v3575_v21 = vpop.eup %3574 }
0x26f4   :  { %v2663_v22 = vadd.f32 1.0, %v3575_v21 }
0x26f6   :  { %3576 = vrcp.f32 %v2663_v22 }
0x2703   :  { %v3577_v23 = vpop.eup %3576 }
0x2704   :  { %v2667_v27 = vmul.f32 %v3577_v23, %v2576_v50 }
0x2764   :  { %v2670_v25 = vpop.permute.xlu0 %2669 }
0x2765   :  { %v2672_v26 = vmul.f32 %v3577_v23, %v2670_v25 }
0x2767   :  { %2674 = vrot.lane.b32.xlu1 %v2672_v26, %s3701_s3 }
0x27d9   :  { %v2675_v30 = vpop.permute.xlu1 %2674 }
0x27da   :  { %v2677_v11 = vadd.f32 %v2675_v30, %v2667_v27 }
0x27dc   :  { %3578 = vtanh.f32 %v2677_v11 }
0x27e9   :  { %v3579_v33 = vpop.eup %3578 }
0x27ea   :  { %2680 = vrot.lane.b32.xlu0 %v3579_v33, %s3700_s28 }
0x285c   :  { %v2681_v34 = vpop.permute.xlu0 %2680 }
0x285d   :  { %v2683_v35 = vmul.f32 %v3577_v23, %v2681_v34 }
0x285f   :  { %v2684_v2 = vadd.f32 %v2683_v35, %v2583_v18 }
0x2861   :  { %v2685_v36 = vmul.f32 0.125, %v2684_v2 }
0x2863   :  { %2698 = vrot.lane.b32.xlu1 %v2685_v36, %s3701_s3 }
0x28d5   :  { %v2699_v37 = vpop.permute.xlu1 %2698 }
0x28d6   :  { %3364 = vmatmul.mubr.msk.f32.vlgmr.msra.gmra.mxu1 %vm111_vm1, %v2699_v37 }
0x2996   :  { %v2768_v6 = vpop.f32.mrf.mxu1 }
0x2997   :  { %v2769_v60 = vadd.f32 %v2940_v39, %v2768_v6 }
0x2998   :  { %v3365_v8 = vpop.f32.mrf.mxu1 }
0x2999   :  { %vm2772_vm3 = vcmp.gt.f32.partialorder %v2769_v60, 0.0  ;;  %v2773_v61 = vmul.f32 0.01, %v2769_v60 }
0x299b   :  { %v2774_v40 = vsel %vm2772_vm3, %v2769_v60, %v2773_v61 }
0x299c   :  { %3375 = vmatmul.mubr.msk.f32.vlgmr.msra.gmra.mxu0 %vm111_vm1, %v2774_v40 }
0x2a5c   :  { %v2855_v41 = vpop.f32.mrf.mxu0 }
0x2a5d   :  { %v2856_v62 = vadd.f32 %v2942_v0, %v2855_v41 }
0x2a5e   :  { %v3376_v42 = vpop.f32.mrf.mxu0 }
0x2a5f   :  { %v2860_v43 = vsel %vm2859_vm4, %v2856_v62, -inf }
0x2a60   :  { %2861 = vmax.xlane.f32.xlu0 %v2860_v43 }
0x2ae9   :  { %v2862_v20 = vpop.xlane.xlu0 %2861 }
0x2aea   :  { %v2863_v44 = vsub.f32 %v2856_v62, %v2862_v20 }
0x2aec   :  { %v2864_v24 = vmul.f32 1.442695, %v2863_v44 }
0x2aee   :  { %3580 = vpow2.f32 %v2864_v24 }
0x2afb   :  { %v3581_v47 = vpop.eup %3580 }
0x2afc   :  { %v2866_v48 = vsel %vm2859_vm4, %v3581_v47, 0.0 }
0x2afd   :  { %2867 = vadd.xlane.f32.xlu1 %v2866_v48 }
0x2b86   :  { %v2868_v51 = vpop.xlane.xlu1 %2867 }
0x2b87   :  { %3582 = vlog2.f32 %v2868_v51 }
0x2b94   :  { %v3583_v52 = vpop.eup %3582 }
0x2b95   :  { %v2870_v53 = vmul.f32 0.6931472, %v3583_v52 }
0x2b97   :  { %v2871_v54 = vsub.f32 %v2863_v44, %v2870_v53 }
0x2b99   :  { %2872 = vst.msk [vmem:[#allocation10] sm:$0x3] %vm2859_vm4, %v2871_v54 }
0x2b9a   :  { %3675 = shalt.err (!%p3672_p10)
}
0x2b9b   :  { %2882 = dma.vmem_to_hbm [thread:$0]  %s2880_s9, 32, %s4344_s11, [#allocation4]  }
0x2b9c   :  { %3690 = dma.done.wait [#allocation4], 32  }
0x2b9d   :  { %3691 = vsyncadd [#allocation4], 4294967264 }
0x2b9e   :  { %2886 = vsyncpa [#allocation3], 1 }
0x2b9f   :  { %2887 = vsyncpa [#allocation6], 1 }
0x2ba0   :  { %2888 = vsyncpa [#allocation9], 1 }
0x2ba1   :  { %2889 = vsyncpa [#allocation4], 1 }

</bundles_post_ra>
